<compile_context>
chip_gen: v7x
topology: tpu7x:2x2x1
jax: 0.10.0
libtpu: 0.0.40
codegen_flags: <defaults>
</compile_context>

<pallas_src>
import math
import jax
import jax.numpy as jnp
from jax.experimental import pallas as pl
from jax.experimental.pallas import tpu as pltpu  # noqa: F401  (kept for future grid/VMEM tuning)

# -------------------- synthetic "opt" config --------------------
VOCAB      = 20
POS_SIZE   = 10
POST_SIZE  = 10
EMBED_DIM  = 24
POS_DIM    = 4
POST_DIM   = 4
RNN_HIDDEN = 32          # opt.rnn_hidden
HIDDEN_DIM = 32          # opt.hidden_dim (= mem_dim)
NUM_LAYERS = 2           # opt.num_layers (GCN layers)
ATTN_HEADS = 2           # opt.attention_heads
POLARITIES = 3           # opt.polarities_dim
D_MODEL    = 2 * RNN_HIDDEN                  # MHA d_model == mem_dim * 2
IN_DIM     = EMBED_DIM + POS_DIM + POST_DIM  # LSTM input size


# -------------------- fused Pallas kernel --------------------
def make_fused_kernel(B, S, num_heads, num_layers):
    H = RNN_HIDDEN
    H2, H4, H6, H8 = 2 * H, 4 * H, 6 * H, 8 * H
    D = D_MODEL
    d_k = D // num_heads
    inv_sqrt_dk = 1.0 / math.sqrt(d_k)
    assert num_layers == 2  # kernel signature is specialized for the config

    def kernel(xb_ref, masks_ref,
               wih_ref, whh_ref, blstm_ref,
               wqk_ref, bqk_ref,
               gw0_ref, gb0_ref, gw1_ref, gb1_ref,
               wc_ref, bc_ref,
               logits_ref):
        bf16 = jnp.bfloat16

        validf = masks_ref[0]            # (B, S)  1.0 where t < len   (pack_padded mask)
        validr = masks_ref[1]            # (B, S)  validf reversed along time
        tokm   = masks_ref[2]            # (B, S)  tok != 0            (src_mask / mask_)
        aspm   = masks_ref[3]            # (B, S)  aspect-span mask

        # ---- bidirectional LSTM: one fused input projection for both directions ----
        # x_big row t = [x_t | x_{S-1-t}]; wih is block-diagonal, so the reverse half
        # of the 8H gate axis already sees the time-reversed input.
        xb = xb_ref[...].reshape(B * S, 2 * IN_DIM).astype(bf16)
        xw = (jnp.dot(xb, wih_ref[...], preferred_element_type=jnp.float32)
              + blstm_ref[...]).reshape(B, S, H8)
        whh = whh_ref[...]               # (2H, 8H) bf16, block-diagonal (fwd | rev)

        # per-step validity selector: cols [0:H) -> fwd valid, [H:2H) -> rev valid
        lane = jax.lax.broadcasted_iota(jnp.int32, (1, 1, H2), 2)
        vsel = jnp.where(lane < H, validf[:, :, None], validr[:, :, None])   # (B,S,2H)

        hfr = jnp.zeros((B, H2), jnp.float32)    # packed state [h_fwd | h_rev]
        cfr = jnp.zeros((B, H2), jnp.float32)
        h_steps = []
        for t in range(S):               # static unroll; S is small
            gates = xw[:, t, :] + jnp.dot(hfr.astype(bf16), whh,
                                          preferred_element_type=jnp.float32)  # (B,8H)
            sg = jax.nn.sigmoid(gates[:, :H6])      # [i | f | o], each (B, 2H)
            g  = jnp.tanh(gates[:, H6:])            # (B, 2H)
            c_new = sg[:, H2:H4] * cfr + sg[:, :H2] * g
            h_new = sg[:, H4:H6] * jnp.tanh(c_new)
            keep = vsel[:, t, :] > 0.0
            cfr = jnp.where(keep, c_new, cfr)       # freeze state on padding
            hfr = jnp.where(keep, h_new, hfr)
            h_steps.append(hfr)

        # scatter packed per-step states back to time order (rev half reversed),
        # zero-fill padded positions (pad_packed semantics).  Pure value ops, no VMEM.
        tids = jax.lax.broadcasted_iota(jnp.int32, (1, S, 1), 1)
        fwd_seq = jnp.zeros((B, S, H), jnp.float32)
        rev_seq = jnp.zeros((B, S, H), jnp.float32)
        for t in range(S):
            fwd_seq = fwd_seq + jnp.where(tids == t,         h_steps[t][:, None, :H], 0.0)
            rev_seq = rev_seq + jnp.where(tids == S - 1 - t, h_steps[t][:, None, H:], 0.0)
        gcn_inputs = (jnp.concatenate([fwd_seq, rev_seq], axis=-1)
                      * validf[:, :, None])                                   # (B,S,D)

        # ---- multi-head attention -> averaged adjacency ----
        x2d = gcn_inputs.reshape(B * S, D).astype(bf16)
        qk = (jnp.dot(x2d, wqk_ref[...], preferred_element_type=jnp.float32)
              + bqk_ref[...])
        q = qk[:, :D].reshape(B, S, D)
        k = qk[:, D:].reshape(B, S, D)
        s_list = []
        for h in range(num_heads):       # heads are tiny (2); MXU pushes only
            qh = q[:, :, h * d_k:(h + 1) * d_k].astype(bf16)
            kh = k[:, :, h * d_k:(h + 1) * d_k].astype(bf16)
            s_list.append(jnp.einsum('bqd,bkd->bqk', qh, kh,
                                     preferred_element_type=jnp.float32))
        scores = jnp.stack(s_list, axis=0) * inv_sqrt_dk      # (heads, B, S, S)
        keymask = tokm[:, None, :] == 0.0                      # (B, 1, S), hoisted
        scores = jnp.where(keymask, -1000000000.0, scores)
        m = jnp.max(scores, axis=-1, keepdims=True)            # single softmax pass
        e = jnp.exp(scores - m)
        p = e * pl.reciprocal(jnp.sum(e, axis=-1, keepdims=True), approx=True)
        adj = jnp.sum(p, axis=0) * (1.0 / num_heads)           # (B, S, S)

        # adj -= diag(diag(adj)); adj += eye  ->  diagonal := 1 ; then row-mask
        rows = jax.lax.broadcasted_iota(jnp.int32, (S, S), 0)
        cols = jax.lax.broadcasted_iota(jnp.int32, (S, S), 1)
        adj = jnp.where((rows == cols)[None, :, :], 1.0, adj)
        adj = adj * tokm[:, :, None]
        rden = 1.0 / (jnp.sum(adj, axis=-1, keepdims=True) + 1.0)   # (B,S,1)

        # ---- GCN layers, reassociated:  adj @ (x @ W) + b, * 1/denom, relu ----
        adj_b = adj.astype(bf16)
        out = gcn_inputs
        gw = (gw0_ref, gw1_ref)
        gb = (gb0_ref, gb1_ref)
        for l in range(num_layers):
            d_in = out.shape[-1]
            xw_l = jnp.dot(out.reshape(B * S, d_in).astype(bf16), gw[l][...],
                           preferred_element_type=jnp.float32).reshape(B, S, HIDDEN_DIM)
            ax = jnp.einsum('bij,bjd->bid', adj_b, xw_l.astype(bf16),
                            preferred_element_type=jnp.float32)
            out = jnp.maximum((ax + gb[l][...]) * rden, 0.0)

        # ---- aspect-masked mean pooling + classifier ----
        arow = aspm[:, :, None]                               # (B, S, 1)
        asp_wn = jnp.sum(arow, axis=1)                        # (B, 1) (matches torch: no zero-guard)
        pooled = jnp.sum(out * arow, axis=1) / asp_wn         # (B, HIDDEN_DIM)
        logits_ref[...] = (jnp.dot(pooled.astype(bf16), wc_ref[...],
                                   preferred_element_type=jnp.float32)
                           + bc_ref[...])

    return kernel


def semgcn_pallas(embs, valid, tok_mask, asp_mask, params):
    B, S, _ = embs.shape
    kernel = make_fused_kernel(B, S, ATTN_HEADS, NUM_LAYERS)
    # reverse-direction input pre-flipped so the fused block-diagonal LSTM sees
    # [x_t | x_{S-1-t}] per step; all masks packed into ONE dense (4, B, S) input.
    x_big = jnp.concatenate([embs, jnp.flip(embs, axis=1)], axis=-1)       # (B, S, 2*IN)
    masks = jnp.stack([valid, jnp.flip(valid, axis=1), tok_mask, asp_mask], axis=0)
    # TODO(synk): at larger batch sizes add a leading batch-tile grid axis with
    # dimension_semantics=("parallel",) so v7x's second TensorCore takes half the
    # batch, and re-budget VMEM (vmem_limit_bytes) against the 64 MiB v7x limit.
    return pl.pallas_call(
        kernel,
        out_shape=jax.ShapeDtypeStruct((B, POLARITIES), jnp.float32),
    )(x_big, masks,
      params["wih"], params["whh"], params["b_lstm"],
      params["wqk"], params["bqk"],
      params["gcn_w"][0], params["gcn_b"][0],
      params["gcn_w"][1], params["gcn_b"][1],
      params["wc"], params["bc"])


# -------------------- wrapper (embedding gathers + masks are plain JAX glue) ----
@jax.jit
def semgcn_forward(params, tok, pos, post, asp_mask, lens):
    B, S = tok.shape
    # TODO(synk): embedding gathers kept in XLA (dynamic row gather not worth a kernel here).
    embs = jnp.concatenate(
        [params["emb"][tok], params["pos_emb"][pos], params["post_emb"][post]], axis=2)
    valid = (jnp.arange(S)[None, :] < lens[:, None]).astype(jnp.float32)  # pack_padded mask
    tok_mask = (tok != 0).astype(jnp.float32)                             # src_mask / mask_
    logits = semgcn_pallas(embs, valid, tok_mask, asp_mask.astype(jnp.float32), params)
    return logits, None


# -------------------- deterministic parameter init --------------------
def init_params(key):
    ks = jax.random.split(key, 20)
    bf16 = jnp.bfloat16

    def nrm(k, shape, s=0.1):
        return (s * jax.random.normal(k, shape)).astype(jnp.float32)

    H = RNN_HIDDEN
    p = {}
    p["emb"]      = nrm(ks[0], (VOCAB, EMBED_DIM))
    p["pos_emb"]  = nrm(ks[1], (POS_SIZE, POS_DIM)).at[0].set(0.0)    # padding_idx=0
    p["post_emb"] = nrm(ks[2], (POST_SIZE, POST_DIM)).at[0].set(0.0)  # padding_idx=0

    # per-direction LSTM params in PyTorch gate order [i, f, g, o]; biases = b_ih + b_hh folded
    wih_f = nrm(ks[3], (IN_DIM, 4 * H)); whh_f = nrm(ks[4], (H, 4 * H)); b_f = nrm(ks[5], (1, 4 * H))
    wih_r = nrm(ks[6], (IN_DIM, 4 * H)); whh_r = nrm(ks[7], (H, 4 * H)); b_r = nrm(ks[8], (1, 4 * H))

    def pack_gates(w_f, w_r):
        """[i,f,g,o] per direction -> fused [i_f,i_r, f_f,f_r, o_f,o_r, g_f,g_r]
        (all sigmoid gates contiguous first, tanh gate last; fwd|rev halves match
        the packed (B, 2H) state layout)."""
        def g(w, j):
            return w[:, j * H:(j + 1) * H]
        return jnp.concatenate([g(w_f, 0), g(w_r, 0),   # i
                                g(w_f, 1), g(w_r, 1),   # f
                                g(w_f, 3), g(w_r, 3),   # o
                                g(w_f, 2), g(w_r, 2)],  # g
                               axis=-1)

    zi = jnp.zeros_like(wih_f)
    zh = jnp.zeros_like(whh_f)
    # block-diagonal fused weights: rows [fwd input | rev (time-flipped) input] / [h_fwd | h_rev]
    p["wih"]    = jnp.concatenate([pack_gates(wih_f, zi),
                                   pack_gates(zi, wih_r)], axis=0).astype(bf16)   # (2*IN, 8H)
    p["whh"]    = jnp.concatenate([pack_gates(whh_f, zh),
                                   pack_gates(zh, whh_r)], axis=0).astype(bf16)   # (2H, 8H)
    p["b_lstm"] = pack_gates(b_f, b_r)                                             # (1, 8H) f32

    # MultiHeadAttention query/key linears packed [Wq | Wk], pre-cast to bf16
    p["wqk"] = jnp.concatenate([nrm(ks[9],  (D_MODEL, D_MODEL)),
                                nrm(ks[11], (D_MODEL, D_MODEL))], axis=1).astype(bf16)
    p["bqk"] = jnp.concatenate([nrm(ks[10], (1, D_MODEL)),
                                nrm(ks[12], (1, D_MODEL))], axis=1)
    # GCN weight_list (layer 0: 2*rnn_hidden -> mem_dim, then mem_dim -> mem_dim)
    p["gcn_w"], p["gcn_b"] = [], []
    in_dims = [D_MODEL] + [HIDDEN_DIM] * (NUM_LAYERS - 1)
    for l in range(NUM_LAYERS):
        p["gcn_w"].append(nrm(ks[13 + l], (in_dims[l], HIDDEN_DIM)).astype(bf16))
        p["gcn_b"].append(nrm(ks[15 + l], (1, HIDDEN_DIM)))
    # classifier
    p["wc"] = nrm(ks[17], (HIDDEN_DIM, POLARITIES)).astype(bf16)
    p["bc"] = nrm(ks[18], (1, POLARITIES))
    return p


if __name__ == "__main__":
    key = jax.random.PRNGKey(0)
    pkey, dkey = jax.random.split(key)
    params = init_params(pkey)

    B, S = 2, 8
    lens = jnp.array([8, 6], dtype=jnp.int32)
    k1, k2, k3 = jax.random.split(dkey, 3)
    valid = jnp.arange(S)[None, :] < lens[:, None]
    tok  = jnp.where(valid, jax.random.randint(k1, (B, S), 1, VOCAB), 0).astype(jnp.int32)
    pos  = jnp.where(valid, jax.random.randint(k2, (B, S), 1, POS_SIZE), 0).astype(jnp.int32)
    post = jnp.where(valid, jax.random.randint(k3, (B, S), 1, POST_SIZE), 0).astype(jnp.int32)
    asp_mask = jnp.zeros((B, S), jnp.float32).at[:, 1:4].set(1.0)  # aspect span

    logits, _ = semgcn_forward(params, tok, pos, post, asp_mask, lens)
    jax.block_until_ready(logits)
    assert logits.shape == (B, POLARITIES)
    print("KERNEL_OK")
</pallas_src>

<mosaic_0001>
module attributes {stable_mosaic.version = 11 : i64} {
  func.func @kernel(%arg0: memref<2x8x64xf32, #tpu.memory_space<vmem>>, %arg1: memref<4x2x8xf32, #tpu.memory_space<vmem>>, %arg2: memref<64x256xbf16, #tpu.memory_space<vmem>>, %arg3: memref<64x256xbf16, #tpu.memory_space<vmem>>, %arg4: memref<1x256xf32, #tpu.memory_space<vmem>>, %arg5: memref<64x128xbf16, #tpu.memory_space<vmem>>, %arg6: memref<1x128xf32, #tpu.memory_space<vmem>>, %arg7: memref<64x32xbf16, #tpu.memory_space<vmem>>, %arg8: memref<1x32xf32, #tpu.memory_space<vmem>>, %arg9: memref<32x32xbf16, #tpu.memory_space<vmem>>, %arg10: memref<1x32xf32, #tpu.memory_space<vmem>>, %arg11: memref<32x3xbf16, #tpu.memory_space<vmem>>, %arg12: memref<1x3xf32, #tpu.memory_space<vmem>>, %arg13: memref<2x3xf32, #tpu.memory_space<vmem>>) attributes {dimension_semantics = [], scalar_prefetch = 0 : i64, scratch_operands = 0 : i64, tpu.core_type = #tpu.core_type<tc>} {
    %c0 = arith.constant 0 : index
    %c0_0 = arith.constant 0 : index
    %c0_1 = arith.constant 0 : index
    %0 = vector.load %arg1[%c0, %c0_0, %c0_1] : memref<4x2x8xf32, #tpu.memory_space<vmem>>, vector<1x2x8xf32>
    %1 = vector.shape_cast %0 : vector<1x2x8xf32> to vector<2x8xf32>
    %c1 = arith.constant 1 : index
    %c0_2 = arith.constant 0 : index
    %c0_3 = arith.constant 0 : index
    %2 = vector.load %arg1[%c1, %c0_2, %c0_3] : memref<4x2x8xf32, #tpu.memory_space<vmem>>, vector<1x2x8xf32>
    %3 = vector.shape_cast %2 : vector<1x2x8xf32> to vector<2x8xf32>
    %c2 = arith.constant 2 : index
    %c0_4 = arith.constant 0 : index
    %c0_5 = arith.constant 0 : index
    %4 = vector.load %arg1[%c2, %c0_4, %c0_5] : memref<4x2x8xf32, #tpu.memory_space<vmem>>, vector<1x2x8xf32>
    %5 = vector.shape_cast %4 : vector<1x2x8xf32> to vector<2x8xf32>
    %c3 = arith.constant 3 : index
    %c0_6 = arith.constant 0 : index
    %c0_7 = arith.constant 0 : index
    %6 = vector.load %arg1[%c3, %c0_6, %c0_7] : memref<4x2x8xf32, #tpu.memory_space<vmem>>, vector<1x2x8xf32>
    %7 = vector.shape_cast %6 : vector<1x2x8xf32> to vector<2x8xf32>
    %c0_8 = arith.constant 0 : index
    %c0_9 = arith.constant 0 : index
    %c0_10 = arith.constant 0 : index
    %8 = vector.load %arg0[%c0_8, %c0_9, %c0_10] : memref<2x8x64xf32, #tpu.memory_space<vmem>>, vector<2x8x64xf32>
    %9 = vector.shape_cast %8 : vector<2x8x64xf32> to vector<16x64xf32>
    %10 = arith.truncf %9 : vector<16x64xf32> to vector<16x64xbf16>
    %c0_11 = arith.constant 0 : index
    %c0_12 = arith.constant 0 : index
    %11 = vector.load %arg2[%c0_11, %c0_12] : memref<64x256xbf16, #tpu.memory_space<vmem>>, vector<64x256xbf16>
    %cst = arith.constant dense<0.000000e+00> : vector<16x256xf32>
    %12 = tpu.matmul %10, %11, %cst {dimension_numbers = #tpu.dot_dimension_numbers<[1], [0], [0], [1], [0, 0, 1, 1], [], []>} : vector<16x64xbf16>, vector<64x256xbf16>, vector<16x256xf32> -> vector<16x256xf32>
    %c0_13 = arith.constant 0 : index
    %c0_14 = arith.constant 0 : index
    %13 = vector.load %arg4[%c0_13, %c0_14] : memref<1x256xf32, #tpu.memory_space<vmem>>, vector<1x256xf32>
    %14 = vector.broadcast %13 : vector<1x256xf32> to vector<16x256xf32>
    %15 = arith.addf %12, %14 : vector<16x256xf32>
    %16 = vector.shape_cast %15 : vector<16x256xf32> to vector<2x8x256xf32>
    %c0_15 = arith.constant 0 : index
    %c0_16 = arith.constant 0 : index
    %17 = vector.load %arg3[%c0_15, %c0_16] : memref<64x256xbf16, #tpu.memory_space<vmem>>, vector<64x256xbf16>
    %18 = tpu.iota {dimensions = array<i32: 2>} : vector<1x1x64xi32>
    %c32_i32 = arith.constant 32 : i32
    %19 = vector.broadcast %c32_i32 : i32 to vector<1x1x64xi32>
    %20 = arith.cmpi slt, %18, %19 : vector<1x1x64xi32>
    %21 = vector.shape_cast %1 : vector<2x8xf32> to vector<2x8x1xf32>
    %22 = vector.shape_cast %3 : vector<2x8xf32> to vector<2x8x1xf32>
    %23 = vector.shape_cast %20 : vector<1x1x64xi1> to vector<1x1x64xi1>
    %24 = vector.broadcast %23 : vector<1x1x64xi1> to vector<2x8x64xi1>
    %25 = vector.shape_cast %21 : vector<2x8x1xf32> to vector<2x8x1xf32>
    %26 = vector.broadcast %25 : vector<2x8x1xf32> to vector<2x8x64xf32>
    %27 = vector.shape_cast %22 : vector<2x8x1xf32> to vector<2x8x1xf32>
    %28 = vector.broadcast %27 : vector<2x8x1xf32> to vector<2x8x64xf32>
    %29 = arith.select %24, %26, %28 : vector<2x8x64xi1>, vector<2x8x64xf32>
    %cst_17 = arith.constant 0.000000e+00 : f32
    %30 = vector.broadcast %cst_17 : f32 to vector<2x64xf32>
    %cst_18 = arith.constant 0.000000e+00 : f32
    %31 = vector.broadcast %cst_18 : f32 to vector<2x64xf32>
    %32 = vector.extract_strided_slice %16 {offsets = [0, 0, 0], sizes = [2, 1, 256], strides = [1, 1, 1]} : vector<2x8x256xf32> to vector<2x1x256xf32>
    %33 = vector.shape_cast %32 : vector<2x1x256xf32> to vector<2x256xf32>
    %34 = arith.truncf %30 : vector<2x64xf32> to vector<2x64xbf16>
    %cst_19 = arith.constant dense<0.000000e+00> : vector<2x256xf32>
    %35 = tpu.matmul %34, %17, %cst_19 {dimension_numbers = #tpu.dot_dimension_numbers<[1], [0], [0], [1], [0, 0, 1, 1], [], []>} : vector<2x64xbf16>, vector<64x256xbf16>, vector<2x256xf32> -> vector<2x256xf32>
    %36 = arith.addf %33, %35 : vector<2x256xf32>
    %37 = vector.extract_strided_slice %36 {offsets = [0, 0], sizes = [2, 192], strides = [1, 1]} : vector<2x256xf32> to vector<2x192xf32>
    %38 = arith.negf %37 : vector<2x192xf32>
    %39 = math.exp %38 : vector<2x192xf32>
    %cst_20 = arith.constant 1.000000e+00 : f32
    %40 = vector.broadcast %cst_20 : f32 to vector<2x192xf32>
    %41 = arith.addf %40, %39 : vector<2x192xf32>
    %42 = arith.divf %40, %41 : vector<2x192xf32>
    %43 = vector.extract_strided_slice %36 {offsets = [0, 192], sizes = [2, 64], strides = [1, 1]} : vector<2x256xf32> to vector<2x64xf32>
    %44 = math.tanh %43 : vector<2x64xf32>
    %45 = vector.extract_strided_slice %42 {offsets = [0, 64], sizes = [2, 64], strides = [1, 1]} : vector<2x192xf32> to vector<2x64xf32>
    %46 = arith.mulf %45, %31 : vector<2x64xf32>
    %47 = vector.extract_strided_slice %42 {offsets = [0, 0], sizes = [2, 64], strides = [1, 1]} : vector<2x192xf32> to vector<2x64xf32>
    %48 = arith.mulf %47, %44 : vector<2x64xf32>
    %49 = arith.addf %46, %48 : vector<2x64xf32>
    %50 = vector.extract_strided_slice %42 {offsets = [0, 128], sizes = [2, 64], strides = [1, 1]} : vector<2x192xf32> to vector<2x64xf32>
    %51 = math.tanh %49 : vector<2x64xf32>
    %52 = arith.mulf %50, %51 : vector<2x64xf32>
    %53 = vector.extract_strided_slice %29 {offsets = [0, 0, 0], sizes = [2, 1, 64], strides = [1, 1, 1]} : vector<2x8x64xf32> to vector<2x1x64xf32>
    %54 = vector.shape_cast %53 : vector<2x1x64xf32> to vector<2x64xf32>
    %cst_21 = arith.constant 0.000000e+00 : f32
    %55 = vector.broadcast %cst_21 : f32 to vector<2x64xf32>
    %56 = arith.cmpf ogt, %54, %55 : vector<2x64xf32>
    %57 = arith.select %56, %49, %31 : vector<2x64xi1>, vector<2x64xf32>
    %58 = arith.select %56, %52, %30 : vector<2x64xi1>, vector<2x64xf32>
    %59 = vector.extract_strided_slice %16 {offsets = [0, 1, 0], sizes = [2, 1, 256], strides = [1, 1, 1]} : vector<2x8x256xf32> to vector<2x1x256xf32>
    %60 = vector.shape_cast %59 : vector<2x1x256xf32> to vector<2x256xf32>
    %61 = arith.truncf %58 : vector<2x64xf32> to vector<2x64xbf16>
    %cst_22 = arith.constant dense<0.000000e+00> : vector<2x256xf32>
    %62 = tpu.matmul %61, %17, %cst_22 {dimension_numbers = #tpu.dot_dimension_numbers<[1], [0], [0], [1], [0, 0, 1, 1], [], []>} : vector<2x64xbf16>, vector<64x256xbf16>, vector<2x256xf32> -> vector<2x256xf32>
    %63 = arith.addf %60, %62 : vector<2x256xf32>
    %64 = vector.extract_strided_slice %63 {offsets = [0, 0], sizes = [2, 192], strides = [1, 1]} : vector<2x256xf32> to vector<2x192xf32>
    %65 = arith.negf %64 : vector<2x192xf32>
    %66 = math.exp %65 : vector<2x192xf32>
    %cst_23 = arith.constant 1.000000e+00 : f32
    %67 = vector.broadcast %cst_23 : f32 to vector<2x192xf32>
    %68 = arith.addf %67, %66 : vector<2x192xf32>
    %69 = arith.divf %67, %68 : vector<2x192xf32>
    %70 = vector.extract_strided_slice %63 {offsets = [0, 192], sizes = [2, 64], strides = [1, 1]} : vector<2x256xf32> to vector<2x64xf32>
    %71 = math.tanh %70 : vector<2x64xf32>
    %72 = vector.extract_strided_slice %69 {offsets = [0, 64], sizes = [2, 64], strides = [1, 1]} : vector<2x192xf32> to vector<2x64xf32>
    %73 = arith.mulf %72, %57 : vector<2x64xf32>
    %74 = vector.extract_strided_slice %69 {offsets = [0, 0], sizes = [2, 64], strides = [1, 1]} : vector<2x192xf32> to vector<2x64xf32>
    %75 = arith.mulf %74, %71 : vector<2x64xf32>
    %76 = arith.addf %73, %75 : vector<2x64xf32>
    %77 = vector.extract_strided_slice %69 {offsets = [0, 128], sizes = [2, 64], strides = [1, 1]} : vector<2x192xf32> to vector<2x64xf32>
    %78 = math.tanh %76 : vector<2x64xf32>
    %79 = arith.mulf %77, %78 : vector<2x64xf32>
    %80 = vector.extract_strided_slice %29 {offsets = [0, 1, 0], sizes = [2, 1, 64], strides = [1, 1, 1]} : vector<2x8x64xf32> to vector<2x1x64xf32>
    %81 = vector.shape_cast %80 : vector<2x1x64xf32> to vector<2x64xf32>
    %cst_24 = arith.constant 0.000000e+00 : f32
    %82 = vector.broadcast %cst_24 : f32 to vector<2x64xf32>
    %83 = arith.cmpf ogt, %81, %82 : vector<2x64xf32>
    %84 = arith.select %83, %76, %57 : vector<2x64xi1>, vector<2x64xf32>
    %85 = arith.select %83, %79, %58 : vector<2x64xi1>, vector<2x64xf32>
    %86 = vector.extract_strided_slice %16 {offsets = [0, 2, 0], sizes = [2, 1, 256], strides = [1, 1, 1]} : vector<2x8x256xf32> to vector<2x1x256xf32>
    %87 = vector.shape_cast %86 : vector<2x1x256xf32> to vector<2x256xf32>
    %88 = arith.truncf %85 : vector<2x64xf32> to vector<2x64xbf16>
    %cst_25 = arith.constant dense<0.000000e+00> : vector<2x256xf32>
    %89 = tpu.matmul %88, %17, %cst_25 {dimension_numbers = #tpu.dot_dimension_numbers<[1], [0], [0], [1], [0, 0, 1, 1], [], []>} : vector<2x64xbf16>, vector<64x256xbf16>, vector<2x256xf32> -> vector<2x256xf32>
    %90 = arith.addf %87, %89 : vector<2x256xf32>
    %91 = vector.extract_strided_slice %90 {offsets = [0, 0], sizes = [2, 192], strides = [1, 1]} : vector<2x256xf32> to vector<2x192xf32>
    %92 = arith.negf %91 : vector<2x192xf32>
    %93 = math.exp %92 : vector<2x192xf32>
    %cst_26 = arith.constant 1.000000e+00 : f32
    %94 = vector.broadcast %cst_26 : f32 to vector<2x192xf32>
    %95 = arith.addf %94, %93 : vector<2x192xf32>
    %96 = arith.divf %94, %95 : vector<2x192xf32>
    %97 = vector.extract_strided_slice %90 {offsets = [0, 192], sizes = [2, 64], strides = [1, 1]} : vector<2x256xf32> to vector<2x64xf32>
    %98 = math.tanh %97 : vector<2x64xf32>
    %99 = vector.extract_strided_slice %96 {offsets = [0, 64], sizes = [2, 64], strides = [1, 1]} : vector<2x192xf32> to vector<2x64xf32>
    %100 = arith.mulf %99, %84 : vector<2x64xf32>
    %101 = vector.extract_strided_slice %96 {offsets = [0, 0], sizes = [2, 64], strides = [1, 1]} : vector<2x192xf32> to vector<2x64xf32>
    %102 = arith.mulf %101, %98 : vector<2x64xf32>
    %103 = arith.addf %100, %102 : vector<2x64xf32>
    %104 = vector.extract_strided_slice %96 {offsets = [0, 128], sizes = [2, 64], strides = [1, 1]} : vector<2x192xf32> to vector<2x64xf32>
    %105 = math.tanh %103 : vector<2x64xf32>
    %106 = arith.mulf %104, %105 : vector<2x64xf32>
    %107 = vector.extract_strided_slice %29 {offsets = [0, 2, 0], sizes = [2, 1, 64], strides = [1, 1, 1]} : vector<2x8x64xf32> to vector<2x1x64xf32>
    %108 = vector.shape_cast %107 : vector<2x1x64xf32> to vector<2x64xf32>
    %cst_27 = arith.constant 0.000000e+00 : f32
    %109 = vector.broadcast %cst_27 : f32 to vector<2x64xf32>
    %110 = arith.cmpf ogt, %108, %109 : vector<2x64xf32>
    %111 = arith.select %110, %103, %84 : vector<2x64xi1>, vector<2x64xf32>
    %112 = arith.select %110, %106, %85 : vector<2x64xi1>, vector<2x64xf32>
    %113 = vector.extract_strided_slice %16 {offsets = [0, 3, 0], sizes = [2, 1, 256], strides = [1, 1, 1]} : vector<2x8x256xf32> to vector<2x1x256xf32>
    %114 = vector.shape_cast %113 : vector<2x1x256xf32> to vector<2x256xf32>
    %115 = arith.truncf %112 : vector<2x64xf32> to vector<2x64xbf16>
    %cst_28 = arith.constant dense<0.000000e+00> : vector<2x256xf32>
    %116 = tpu.matmul %115, %17, %cst_28 {dimension_numbers = #tpu.dot_dimension_numbers<[1], [0], [0], [1], [0, 0, 1, 1], [], []>} : vector<2x64xbf16>, vector<64x256xbf16>, vector<2x256xf32> -> vector<2x256xf32>
    %117 = arith.addf %114, %116 : vector<2x256xf32>
    %118 = vector.extract_strided_slice %117 {offsets = [0, 0], sizes = [2, 192], strides = [1, 1]} : vector<2x256xf32> to vector<2x192xf32>
    %119 = arith.negf %118 : vector<2x192xf32>
    %120 = math.exp %119 : vector<2x192xf32>
    %cst_29 = arith.constant 1.000000e+00 : f32
    %121 = vector.broadcast %cst_29 : f32 to vector<2x192xf32>
    %122 = arith.addf %121, %120 : vector<2x192xf32>
    %123 = arith.divf %121, %122 : vector<2x192xf32>
    %124 = vector.extract_strided_slice %117 {offsets = [0, 192], sizes = [2, 64], strides = [1, 1]} : vector<2x256xf32> to vector<2x64xf32>
    %125 = math.tanh %124 : vector<2x64xf32>
    %126 = vector.extract_strided_slice %123 {offsets = [0, 64], sizes = [2, 64], strides = [1, 1]} : vector<2x192xf32> to vector<2x64xf32>
    %127 = arith.mulf %126, %111 : vector<2x64xf32>
    %128 = vector.extract_strided_slice %123 {offsets = [0, 0], sizes = [2, 64], strides = [1, 1]} : vector<2x192xf32> to vector<2x64xf32>
    %129 = arith.mulf %128, %125 : vector<2x64xf32>
    %130 = arith.addf %127, %129 : vector<2x64xf32>
    %131 = vector.extract_strided_slice %123 {offsets = [0, 128], sizes = [2, 64], strides = [1, 1]} : vector<2x192xf32> to vector<2x64xf32>
    %132 = math.tanh %130 : vector<2x64xf32>
    %133 = arith.mulf %131, %132 : vector<2x64xf32>
    %134 = vector.extract_strided_slice %29 {offsets = [0, 3, 0], sizes = [2, 1, 64], strides = [1, 1, 1]} : vector<2x8x64xf32> to vector<2x1x64xf32>
    %135 = vector.shape_cast %134 : vector<2x1x64xf32> to vector<2x64xf32>
    %cst_30 = arith.constant 0.000000e+00 : f32
    %136 = vector.broadcast %cst_30 : f32 to vector<2x64xf32>
    %137 = arith.cmpf ogt, %135, %136 : vector<2x64xf32>
    %138 = arith.select %137, %130, %111 : vector<2x64xi1>, vector<2x64xf32>
    %139 = arith.select %137, %133, %112 : vector<2x64xi1>, vector<2x64xf32>
    %140 = vector.extract_strided_slice %16 {offsets = [0, 4, 0], sizes = [2, 1, 256], strides = [1, 1, 1]} : vector<2x8x256xf32> to vector<2x1x256xf32>
    %141 = vector.shape_cast %140 : vector<2x1x256xf32> to vector<2x256xf32>
    %142 = arith.truncf %139 : vector<2x64xf32> to vector<2x64xbf16>
    %cst_31 = arith.constant dense<0.000000e+00> : vector<2x256xf32>
    %143 = tpu.matmul %142, %17, %cst_31 {dimension_numbers = #tpu.dot_dimension_numbers<[1], [0], [0], [1], [0, 0, 1, 1], [], []>} : vector<2x64xbf16>, vector<64x256xbf16>, vector<2x256xf32> -> vector<2x256xf32>
    %144 = arith.addf %141, %143 : vector<2x256xf32>
    %145 = vector.extract_strided_slice %144 {offsets = [0, 0], sizes = [2, 192], strides = [1, 1]} : vector<2x256xf32> to vector<2x192xf32>
    %146 = arith.negf %145 : vector<2x192xf32>
    %147 = math.exp %146 : vector<2x192xf32>
    %cst_32 = arith.constant 1.000000e+00 : f32
    %148 = vector.broadcast %cst_32 : f32 to vector<2x192xf32>
    %149 = arith.addf %148, %147 : vector<2x192xf32>
    %150 = arith.divf %148, %149 : vector<2x192xf32>
    %151 = vector.extract_strided_slice %144 {offsets = [0, 192], sizes = [2, 64], strides = [1, 1]} : vector<2x256xf32> to vector<2x64xf32>
    %152 = math.tanh %151 : vector<2x64xf32>
    %153 = vector.extract_strided_slice %150 {offsets = [0, 64], sizes = [2, 64], strides = [1, 1]} : vector<2x192xf32> to vector<2x64xf32>
    %154 = arith.mulf %153, %138 : vector<2x64xf32>
    %155 = vector.extract_strided_slice %150 {offsets = [0, 0], sizes = [2, 64], strides = [1, 1]} : vector<2x192xf32> to vector<2x64xf32>
    %156 = arith.mulf %155, %152 : vector<2x64xf32>
    %157 = arith.addf %154, %156 : vector<2x64xf32>
    %158 = vector.extract_strided_slice %150 {offsets = [0, 128], sizes = [2, 64], strides = [1, 1]} : vector<2x192xf32> to vector<2x64xf32>
    %159 = math.tanh %157 : vector<2x64xf32>
    %160 = arith.mulf %158, %159 : vector<2x64xf32>
    %161 = vector.extract_strided_slice %29 {offsets = [0, 4, 0], sizes = [2, 1, 64], strides = [1, 1, 1]} : vector<2x8x64xf32> to vector<2x1x64xf32>
    %162 = vector.shape_cast %161 : vector<2x1x64xf32> to vector<2x64xf32>
    %cst_33 = arith.constant 0.000000e+00 : f32
    %163 = vector.broadcast %cst_33 : f32 to vector<2x64xf32>
    %164 = arith.cmpf ogt, %162, %163 : vector<2x64xf32>
    %165 = arith.select %164, %157, %138 : vector<2x64xi1>, vector<2x64xf32>
    %166 = arith.select %164, %160, %139 : vector<2x64xi1>, vector<2x64xf32>
    %167 = vector.extract_strided_slice %16 {offsets = [0, 5, 0], sizes = [2, 1, 256], strides = [1, 1, 1]} : vector<2x8x256xf32> to vector<2x1x256xf32>
    %168 = vector.shape_cast %167 : vector<2x1x256xf32> to vector<2x256xf32>
    %169 = arith.truncf %166 : vector<2x64xf32> to vector<2x64xbf16>
    %cst_34 = arith.constant dense<0.000000e+00> : vector<2x256xf32>
    %170 = tpu.matmul %169, %17, %cst_34 {dimension_numbers = #tpu.dot_dimension_numbers<[1], [0], [0], [1], [0, 0, 1, 1], [], []>} : vector<2x64xbf16>, vector<64x256xbf16>, vector<2x256xf32> -> vector<2x256xf32>
    %171 = arith.addf %168, %170 : vector<2x256xf32>
    %172 = vector.extract_strided_slice %171 {offsets = [0, 0], sizes = [2, 192], strides = [1, 1]} : vector<2x256xf32> to vector<2x192xf32>
    %173 = arith.negf %172 : vector<2x192xf32>
    %174 = math.exp %173 : vector<2x192xf32>
    %cst_35 = arith.constant 1.000000e+00 : f32
    %175 = vector.broadcast %cst_35 : f32 to vector<2x192xf32>
    %176 = arith.addf %175, %174 : vector<2x192xf32>
    %177 = arith.divf %175, %176 : vector<2x192xf32>
    %178 = vector.extract_strided_slice %171 {offsets = [0, 192], sizes = [2, 64], strides = [1, 1]} : vector<2x256xf32> to vector<2x64xf32>
    %179 = math.tanh %178 : vector<2x64xf32>
    %180 = vector.extract_strided_slice %177 {offsets = [0, 64], sizes = [2, 64], strides = [1, 1]} : vector<2x192xf32> to vector<2x64xf32>
    %181 = arith.mulf %180, %165 : vector<2x64xf32>
    %182 = vector.extract_strided_slice %177 {offsets = [0, 0], sizes = [2, 64], strides = [1, 1]} : vector<2x192xf32> to vector<2x64xf32>
    %183 = arith.mulf %182, %179 : vector<2x64xf32>
    %184 = arith.addf %181, %183 : vector<2x64xf32>
    %185 = vector.extract_strided_slice %177 {offsets = [0, 128], sizes = [2, 64], strides = [1, 1]} : vector<2x192xf32> to vector<2x64xf32>
    %186 = math.tanh %184 : vector<2x64xf32>
    %187 = arith.mulf %185, %186 : vector<2x64xf32>
    %188 = vector.extract_strided_slice %29 {offsets = [0, 5, 0], sizes = [2, 1, 64], strides = [1, 1, 1]} : vector<2x8x64xf32> to vector<2x1x64xf32>
    %189 = vector.shape_cast %188 : vector<2x1x64xf32> to vector<2x64xf32>
    %cst_36 = arith.constant 0.000000e+00 : f32
    %190 = vector.broadcast %cst_36 : f32 to vector<2x64xf32>
    %191 = arith.cmpf ogt, %189, %190 : vector<2x64xf32>
    %192 = arith.select %191, %184, %165 : vector<2x64xi1>, vector<2x64xf32>
    %193 = arith.select %191, %187, %166 : vector<2x64xi1>, vector<2x64xf32>
    %194 = vector.extract_strided_slice %16 {offsets = [0, 6, 0], sizes = [2, 1, 256], strides = [1, 1, 1]} : vector<2x8x256xf32> to vector<2x1x256xf32>
    %195 = vector.shape_cast %194 : vector<2x1x256xf32> to vector<2x256xf32>
    %196 = arith.truncf %193 : vector<2x64xf32> to vector<2x64xbf16>
    %cst_37 = arith.constant dense<0.000000e+00> : vector<2x256xf32>
    %197 = tpu.matmul %196, %17, %cst_37 {dimension_numbers = #tpu.dot_dimension_numbers<[1], [0], [0], [1], [0, 0, 1, 1], [], []>} : vector<2x64xbf16>, vector<64x256xbf16>, vector<2x256xf32> -> vector<2x256xf32>
    %198 = arith.addf %195, %197 : vector<2x256xf32>
    %199 = vector.extract_strided_slice %198 {offsets = [0, 0], sizes = [2, 192], strides = [1, 1]} : vector<2x256xf32> to vector<2x192xf32>
    %200 = arith.negf %199 : vector<2x192xf32>
    %201 = math.exp %200 : vector<2x192xf32>
    %cst_38 = arith.constant 1.000000e+00 : f32
    %202 = vector.broadcast %cst_38 : f32 to vector<2x192xf32>
    %203 = arith.addf %202, %201 : vector<2x192xf32>
    %204 = arith.divf %202, %203 : vector<2x192xf32>
    %205 = vector.extract_strided_slice %198 {offsets = [0, 192], sizes = [2, 64], strides = [1, 1]} : vector<2x256xf32> to vector<2x64xf32>
    %206 = math.tanh %205 : vector<2x64xf32>
    %207 = vector.extract_strided_slice %204 {offsets = [0, 64], sizes = [2, 64], strides = [1, 1]} : vector<2x192xf32> to vector<2x64xf32>
    %208 = arith.mulf %207, %192 : vector<2x64xf32>
    %209 = vector.extract_strided_slice %204 {offsets = [0, 0], sizes = [2, 64], strides = [1, 1]} : vector<2x192xf32> to vector<2x64xf32>
    %210 = arith.mulf %209, %206 : vector<2x64xf32>
    %211 = arith.addf %208, %210 : vector<2x64xf32>
    %212 = vector.extract_strided_slice %204 {offsets = [0, 128], sizes = [2, 64], strides = [1, 1]} : vector<2x192xf32> to vector<2x64xf32>
    %213 = math.tanh %211 : vector<2x64xf32>
    %214 = arith.mulf %212, %213 : vector<2x64xf32>
    %215 = vector.extract_strided_slice %29 {offsets = [0, 6, 0], sizes = [2, 1, 64], strides = [1, 1, 1]} : vector<2x8x64xf32> to vector<2x1x64xf32>
    %216 = vector.shape_cast %215 : vector<2x1x64xf32> to vector<2x64xf32>
    %cst_39 = arith.constant 0.000000e+00 : f32
    %217 = vector.broadcast %cst_39 : f32 to vector<2x64xf32>
    %218 = arith.cmpf ogt, %216, %217 : vector<2x64xf32>
    %219 = arith.select %218, %211, %192 : vector<2x64xi1>, vector<2x64xf32>
    %220 = arith.select %218, %214, %193 : vector<2x64xi1>, vector<2x64xf32>
    %221 = vector.extract_strided_slice %16 {offsets = [0, 7, 0], sizes = [2, 1, 256], strides = [1, 1, 1]} : vector<2x8x256xf32> to vector<2x1x256xf32>
    %222 = vector.shape_cast %221 : vector<2x1x256xf32> to vector<2x256xf32>
    %223 = arith.truncf %220 : vector<2x64xf32> to vector<2x64xbf16>
    %cst_40 = arith.constant dense<0.000000e+00> : vector<2x256xf32>
    %224 = tpu.matmul %223, %17, %cst_40 {dimension_numbers = #tpu.dot_dimension_numbers<[1], [0], [0], [1], [0, 0, 1, 1], [], []>} : vector<2x64xbf16>, vector<64x256xbf16>, vector<2x256xf32> -> vector<2x256xf32>
    %225 = arith.addf %222, %224 : vector<2x256xf32>
    %226 = vector.extract_strided_slice %225 {offsets = [0, 0], sizes = [2, 192], strides = [1, 1]} : vector<2x256xf32> to vector<2x192xf32>
    %227 = arith.negf %226 : vector<2x192xf32>
    %228 = math.exp %227 : vector<2x192xf32>
    %cst_41 = arith.constant 1.000000e+00 : f32
    %229 = vector.broadcast %cst_41 : f32 to vector<2x192xf32>
    %230 = arith.addf %229, %228 : vector<2x192xf32>
    %231 = arith.divf %229, %230 : vector<2x192xf32>
    %232 = vector.extract_strided_slice %225 {offsets = [0, 192], sizes = [2, 64], strides = [1, 1]} : vector<2x256xf32> to vector<2x64xf32>
    %233 = math.tanh %232 : vector<2x64xf32>
    %234 = vector.extract_strided_slice %231 {offsets = [0, 64], sizes = [2, 64], strides = [1, 1]} : vector<2x192xf32> to vector<2x64xf32>
    %235 = arith.mulf %234, %219 : vector<2x64xf32>
    %236 = vector.extract_strided_slice %231 {offsets = [0, 0], sizes = [2, 64], strides = [1, 1]} : vector<2x192xf32> to vector<2x64xf32>
    %237 = arith.mulf %236, %233 : vector<2x64xf32>
    %238 = arith.addf %235, %237 : vector<2x64xf32>
    %239 = vector.extract_strided_slice %231 {offsets = [0, 128], sizes = [2, 64], strides = [1, 1]} : vector<2x192xf32> to vector<2x64xf32>
    %240 = math.tanh %238 : vector<2x64xf32>
    %241 = arith.mulf %239, %240 : vector<2x64xf32>
    %242 = vector.extract_strided_slice %29 {offsets = [0, 7, 0], sizes = [2, 1, 64], strides = [1, 1, 1]} : vector<2x8x64xf32> to vector<2x1x64xf32>
    %243 = vector.shape_cast %242 : vector<2x1x64xf32> to vector<2x64xf32>
    %cst_42 = arith.constant 0.000000e+00 : f32
    %244 = vector.broadcast %cst_42 : f32 to vector<2x64xf32>
    %245 = arith.cmpf ogt, %243, %244 : vector<2x64xf32>
    %246 = arith.select %245, %241, %220 : vector<2x64xi1>, vector<2x64xf32>
    %247 = tpu.iota {dimensions = array<i32: 1>} : vector<1x8x1xi32>
    %cst_43 = arith.constant 0.000000e+00 : f32
    %248 = vector.broadcast %cst_43 : f32 to vector<2x8x32xf32>
    %cst_44 = arith.constant 0.000000e+00 : f32
    %249 = vector.broadcast %cst_44 : f32 to vector<2x8x32xf32>
    %c0_i32 = arith.constant 0 : i32
    %250 = vector.broadcast %c0_i32 : i32 to vector<1x8x1xi32>
    %251 = arith.cmpi eq, %247, %250 : vector<1x8x1xi32>
    %252 = vector.extract_strided_slice %58 {offsets = [0, 0], sizes = [2, 32], strides = [1, 1]} : vector<2x64xf32> to vector<2x32xf32>
    %253 = vector.shape_cast %252 : vector<2x32xf32> to vector<2x1x32xf32>
    %cst_45 = arith.constant 0.000000e+00 : f32
    %254 = vector.shape_cast %251 : vector<1x8x1xi1> to vector<1x8x1xi1>
    %255 = vector.broadcast %254 : vector<1x8x1xi1> to vector<2x8x32xi1>
    %256 = vector.shape_cast %253 : vector<2x1x32xf32> to vector<2x1x32xf32>
    %257 = vector.broadcast %256 : vector<2x1x32xf32> to vector<2x8x32xf32>
    %258 = vector.broadcast %cst_45 : f32 to vector<2x8x32xf32>
    %259 = arith.select %255, %257, %258 : vector<2x8x32xi1>, vector<2x8x32xf32>
    %260 = arith.addf %248, %259 : vector<2x8x32xf32>
    %c7_i32 = arith.constant 7 : i32
    %261 = vector.broadcast %c7_i32 : i32 to vector<1x8x1xi32>
    %262 = arith.cmpi eq, %247, %261 : vector<1x8x1xi32>
    %263 = vector.extract_strided_slice %58 {offsets = [0, 32], sizes = [2, 32], strides = [1, 1]} : vector<2x64xf32> to vector<2x32xf32>
    %264 = vector.shape_cast %263 : vector<2x32xf32> to vector<2x1x32xf32>
    %cst_46 = arith.constant 0.000000e+00 : f32
    %265 = vector.shape_cast %262 : vector<1x8x1xi1> to vector<1x8x1xi1>
    %266 = vector.broadcast %265 : vector<1x8x1xi1> to vector<2x8x32xi1>
    %267 = vector.shape_cast %264 : vector<2x1x32xf32> to vector<2x1x32xf32>
    %268 = vector.broadcast %267 : vector<2x1x32xf32> to vector<2x8x32xf32>
    %269 = vector.broadcast %cst_46 : f32 to vector<2x8x32xf32>
    %270 = arith.select %266, %268, %269 : vector<2x8x32xi1>, vector<2x8x32xf32>
    %271 = arith.addf %249, %270 : vector<2x8x32xf32>
    %c1_i32 = arith.constant 1 : i32
    %272 = vector.broadcast %c1_i32 : i32 to vector<1x8x1xi32>
    %273 = arith.cmpi eq, %247, %272 : vector<1x8x1xi32>
    %274 = vector.extract_strided_slice %85 {offsets = [0, 0], sizes = [2, 32], strides = [1, 1]} : vector<2x64xf32> to vector<2x32xf32>
    %275 = vector.shape_cast %274 : vector<2x32xf32> to vector<2x1x32xf32>
    %cst_47 = arith.constant 0.000000e+00 : f32
    %276 = vector.shape_cast %273 : vector<1x8x1xi1> to vector<1x8x1xi1>
    %277 = vector.broadcast %276 : vector<1x8x1xi1> to vector<2x8x32xi1>
    %278 = vector.shape_cast %275 : vector<2x1x32xf32> to vector<2x1x32xf32>
    %279 = vector.broadcast %278 : vector<2x1x32xf32> to vector<2x8x32xf32>
    %280 = vector.broadcast %cst_47 : f32 to vector<2x8x32xf32>
    %281 = arith.select %277, %279, %280 : vector<2x8x32xi1>, vector<2x8x32xf32>
    %282 = arith.addf %260, %281 : vector<2x8x32xf32>
    %c6_i32 = arith.constant 6 : i32
    %283 = vector.broadcast %c6_i32 : i32 to vector<1x8x1xi32>
    %284 = arith.cmpi eq, %247, %283 : vector<1x8x1xi32>
    %285 = vector.extract_strided_slice %85 {offsets = [0, 32], sizes = [2, 32], strides = [1, 1]} : vector<2x64xf32> to vector<2x32xf32>
    %286 = vector.shape_cast %285 : vector<2x32xf32> to vector<2x1x32xf32>
    %cst_48 = arith.constant 0.000000e+00 : f32
    %287 = vector.shape_cast %284 : vector<1x8x1xi1> to vector<1x8x1xi1>
    %288 = vector.broadcast %287 : vector<1x8x1xi1> to vector<2x8x32xi1>
    %289 = vector.shape_cast %286 : vector<2x1x32xf32> to vector<2x1x32xf32>
    %290 = vector.broadcast %289 : vector<2x1x32xf32> to vector<2x8x32xf32>
    %291 = vector.broadcast %cst_48 : f32 to vector<2x8x32xf32>
    %292 = arith.select %288, %290, %291 : vector<2x8x32xi1>, vector<2x8x32xf32>
    %293 = arith.addf %271, %292 : vector<2x8x32xf32>
    %c2_i32 = arith.constant 2 : i32
    %294 = vector.broadcast %c2_i32 : i32 to vector<1x8x1xi32>
    %295 = arith.cmpi eq, %247, %294 : vector<1x8x1xi32>
    %296 = vector.extract_strided_slice %112 {offsets = [0, 0], sizes = [2, 32], strides = [1, 1]} : vector<2x64xf32> to vector<2x32xf32>
    %297 = vector.shape_cast %296 : vector<2x32xf32> to vector<2x1x32xf32>
    %cst_49 = arith.constant 0.000000e+00 : f32
    %298 = vector.shape_cast %295 : vector<1x8x1xi1> to vector<1x8x1xi1>
    %299 = vector.broadcast %298 : vector<1x8x1xi1> to vector<2x8x32xi1>
    %300 = vector.shape_cast %297 : vector<2x1x32xf32> to vector<2x1x32xf32>
    %301 = vector.broadcast %300 : vector<2x1x32xf32> to vector<2x8x32xf32>
    %302 = vector.broadcast %cst_49 : f32 to vector<2x8x32xf32>
    %303 = arith.select %299, %301, %302 : vector<2x8x32xi1>, vector<2x8x32xf32>
    %304 = arith.addf %282, %303 : vector<2x8x32xf32>
    %c5_i32 = arith.constant 5 : i32
    %305 = vector.broadcast %c5_i32 : i32 to vector<1x8x1xi32>
    %306 = arith.cmpi eq, %247, %305 : vector<1x8x1xi32>
    %307 = vector.extract_strided_slice %112 {offsets = [0, 32], sizes = [2, 32], strides = [1, 1]} : vector<2x64xf32> to vector<2x32xf32>
    %308 = vector.shape_cast %307 : vector<2x32xf32> to vector<2x1x32xf32>
    %cst_50 = arith.constant 0.000000e+00 : f32
    %309 = vector.shape_cast %306 : vector<1x8x1xi1> to vector<1x8x1xi1>
    %310 = vector.broadcast %309 : vector<1x8x1xi1> to vector<2x8x32xi1>
    %311 = vector.shape_cast %308 : vector<2x1x32xf32> to vector<2x1x32xf32>
    %312 = vector.broadcast %311 : vector<2x1x32xf32> to vector<2x8x32xf32>
    %313 = vector.broadcast %cst_50 : f32 to vector<2x8x32xf32>
    %314 = arith.select %310, %312, %313 : vector<2x8x32xi1>, vector<2x8x32xf32>
    %315 = arith.addf %293, %314 : vector<2x8x32xf32>
    %c3_i32 = arith.constant 3 : i32
    %316 = vector.broadcast %c3_i32 : i32 to vector<1x8x1xi32>
    %317 = arith.cmpi eq, %247, %316 : vector<1x8x1xi32>
    %318 = vector.extract_strided_slice %139 {offsets = [0, 0], sizes = [2, 32], strides = [1, 1]} : vector<2x64xf32> to vector<2x32xf32>
    %319 = vector.shape_cast %318 : vector<2x32xf32> to vector<2x1x32xf32>
    %cst_51 = arith.constant 0.000000e+00 : f32
    %320 = vector.shape_cast %317 : vector<1x8x1xi1> to vector<1x8x1xi1>
    %321 = vector.broadcast %320 : vector<1x8x1xi1> to vector<2x8x32xi1>
    %322 = vector.shape_cast %319 : vector<2x1x32xf32> to vector<2x1x32xf32>
    %323 = vector.broadcast %322 : vector<2x1x32xf32> to vector<2x8x32xf32>
    %324 = vector.broadcast %cst_51 : f32 to vector<2x8x32xf32>
    %325 = arith.select %321, %323, %324 : vector<2x8x32xi1>, vector<2x8x32xf32>
    %326 = arith.addf %304, %325 : vector<2x8x32xf32>
    %c4_i32 = arith.constant 4 : i32
    %327 = vector.broadcast %c4_i32 : i32 to vector<1x8x1xi32>
    %328 = arith.cmpi eq, %247, %327 : vector<1x8x1xi32>
    %329 = vector.extract_strided_slice %139 {offsets = [0, 32], sizes = [2, 32], strides = [1, 1]} : vector<2x64xf32> to vector<2x32xf32>
    %330 = vector.shape_cast %329 : vector<2x32xf32> to vector<2x1x32xf32>
    %cst_52 = arith.constant 0.000000e+00 : f32
    %331 = vector.shape_cast %328 : vector<1x8x1xi1> to vector<1x8x1xi1>
    %332 = vector.broadcast %331 : vector<1x8x1xi1> to vector<2x8x32xi1>
    %333 = vector.shape_cast %330 : vector<2x1x32xf32> to vector<2x1x32xf32>
    %334 = vector.broadcast %333 : vector<2x1x32xf32> to vector<2x8x32xf32>
    %335 = vector.broadcast %cst_52 : f32 to vector<2x8x32xf32>
    %336 = arith.select %332, %334, %335 : vector<2x8x32xi1>, vector<2x8x32xf32>
    %337 = arith.addf %315, %336 : vector<2x8x32xf32>
    %c4_i32_53 = arith.constant 4 : i32
    %338 = vector.broadcast %c4_i32_53 : i32 to vector<1x8x1xi32>
    %339 = arith.cmpi eq, %247, %338 : vector<1x8x1xi32>
    %340 = vector.extract_strided_slice %166 {offsets = [0, 0], sizes = [2, 32], strides = [1, 1]} : vector<2x64xf32> to vector<2x32xf32>
    %341 = vector.shape_cast %340 : vector<2x32xf32> to vector<2x1x32xf32>
    %cst_54 = arith.constant 0.000000e+00 : f32
    %342 = vector.shape_cast %339 : vector<1x8x1xi1> to vector<1x8x1xi1>
    %343 = vector.broadcast %342 : vector<1x8x1xi1> to vector<2x8x32xi1>
    %344 = vector.shape_cast %341 : vector<2x1x32xf32> to vector<2x1x32xf32>
    %345 = vector.broadcast %344 : vector<2x1x32xf32> to vector<2x8x32xf32>
    %346 = vector.broadcast %cst_54 : f32 to vector<2x8x32xf32>
    %347 = arith.select %343, %345, %346 : vector<2x8x32xi1>, vector<2x8x32xf32>
    %348 = arith.addf %326, %347 : vector<2x8x32xf32>
    %c3_i32_55 = arith.constant 3 : i32
    %349 = vector.broadcast %c3_i32_55 : i32 to vector<1x8x1xi32>
    %350 = arith.cmpi eq, %247, %349 : vector<1x8x1xi32>
    %351 = vector.extract_strided_slice %166 {offsets = [0, 32], sizes = [2, 32], strides = [1, 1]} : vector<2x64xf32> to vector<2x32xf32>
    %352 = vector.shape_cast %351 : vector<2x32xf32> to vector<2x1x32xf32>
    %cst_56 = arith.constant 0.000000e+00 : f32
    %353 = vector.shape_cast %350 : vector<1x8x1xi1> to vector<1x8x1xi1>
    %354 = vector.broadcast %353 : vector<1x8x1xi1> to vector<2x8x32xi1>
    %355 = vector.shape_cast %352 : vector<2x1x32xf32> to vector<2x1x32xf32>
    %356 = vector.broadcast %355 : vector<2x1x32xf32> to vector<2x8x32xf32>
    %357 = vector.broadcast %cst_56 : f32 to vector<2x8x32xf32>
    %358 = arith.select %354, %356, %357 : vector<2x8x32xi1>, vector<2x8x32xf32>
    %359 = arith.addf %337, %358 : vector<2x8x32xf32>
    %c5_i32_57 = arith.constant 5 : i32
    %360 = vector.broadcast %c5_i32_57 : i32 to vector<1x8x1xi32>
    %361 = arith.cmpi eq, %247, %360 : vector<1x8x1xi32>
    %362 = vector.extract_strided_slice %193 {offsets = [0, 0], sizes = [2, 32], strides = [1, 1]} : vector<2x64xf32> to vector<2x32xf32>
    %363 = vector.shape_cast %362 : vector<2x32xf32> to vector<2x1x32xf32>
    %cst_58 = arith.constant 0.000000e+00 : f32
    %364 = vector.shape_cast %361 : vector<1x8x1xi1> to vector<1x8x1xi1>
    %365 = vector.broadcast %364 : vector<1x8x1xi1> to vector<2x8x32xi1>
    %366 = vector.shape_cast %363 : vector<2x1x32xf32> to vector<2x1x32xf32>
    %367 = vector.broadcast %366 : vector<2x1x32xf32> to vector<2x8x32xf32>
    %368 = vector.broadcast %cst_58 : f32 to vector<2x8x32xf32>
    %369 = arith.select %365, %367, %368 : vector<2x8x32xi1>, vector<2x8x32xf32>
    %370 = arith.addf %348, %369 : vector<2x8x32xf32>
    %c2_i32_59 = arith.constant 2 : i32
    %371 = vector.broadcast %c2_i32_59 : i32 to vector<1x8x1xi32>
    %372 = arith.cmpi eq, %247, %371 : vector<1x8x1xi32>
    %373 = vector.extract_strided_slice %193 {offsets = [0, 32], sizes = [2, 32], strides = [1, 1]} : vector<2x64xf32> to vector<2x32xf32>
    %374 = vector.shape_cast %373 : vector<2x32xf32> to vector<2x1x32xf32>
    %cst_60 = arith.constant 0.000000e+00 : f32
    %375 = vector.shape_cast %372 : vector<1x8x1xi1> to vector<1x8x1xi1>
    %376 = vector.broadcast %375 : vector<1x8x1xi1> to vector<2x8x32xi1>
    %377 = vector.shape_cast %374 : vector<2x1x32xf32> to vector<2x1x32xf32>
    %378 = vector.broadcast %377 : vector<2x1x32xf32> to vector<2x8x32xf32>
    %379 = vector.broadcast %cst_60 : f32 to vector<2x8x32xf32>
    %380 = arith.select %376, %378, %379 : vector<2x8x32xi1>, vector<2x8x32xf32>
    %381 = arith.addf %359, %380 : vector<2x8x32xf32>
    %c6_i32_61 = arith.constant 6 : i32
    %382 = vector.broadcast %c6_i32_61 : i32 to vector<1x8x1xi32>
    %383 = arith.cmpi eq, %247, %382 : vector<1x8x1xi32>
    %384 = vector.extract_strided_slice %220 {offsets = [0, 0], sizes = [2, 32], strides = [1, 1]} : vector<2x64xf32> to vector<2x32xf32>
    %385 = vector.shape_cast %384 : vector<2x32xf32> to vector<2x1x32xf32>
    %cst_62 = arith.constant 0.000000e+00 : f32
    %386 = vector.shape_cast %383 : vector<1x8x1xi1> to vector<1x8x1xi1>
    %387 = vector.broadcast %386 : vector<1x8x1xi1> to vector<2x8x32xi1>
    %388 = vector.shape_cast %385 : vector<2x1x32xf32> to vector<2x1x32xf32>
    %389 = vector.broadcast %388 : vector<2x1x32xf32> to vector<2x8x32xf32>
    %390 = vector.broadcast %cst_62 : f32 to vector<2x8x32xf32>
    %391 = arith.select %387, %389, %390 : vector<2x8x32xi1>, vector<2x8x32xf32>
    %392 = arith.addf %370, %391 : vector<2x8x32xf32>
    %c1_i32_63 = arith.constant 1 : i32
    %393 = vector.broadcast %c1_i32_63 : i32 to vector<1x8x1xi32>
    %394 = arith.cmpi eq, %247, %393 : vector<1x8x1xi32>
    %395 = vector.extract_strided_slice %220 {offsets = [0, 32], sizes = [2, 32], strides = [1, 1]} : vector<2x64xf32> to vector<2x32xf32>
    %396 = vector.shape_cast %395 : vector<2x32xf32> to vector<2x1x32xf32>
    %cst_64 = arith.constant 0.000000e+00 : f32
    %397 = vector.shape_cast %394 : vector<1x8x1xi1> to vector<1x8x1xi1>
    %398 = vector.broadcast %397 : vector<1x8x1xi1> to vector<2x8x32xi1>
    %399 = vector.shape_cast %396 : vector<2x1x32xf32> to vector<2x1x32xf32>
    %400 = vector.broadcast %399 : vector<2x1x32xf32> to vector<2x8x32xf32>
    %401 = vector.broadcast %cst_64 : f32 to vector<2x8x32xf32>
    %402 = arith.select %398, %400, %401 : vector<2x8x32xi1>, vector<2x8x32xf32>
    %403 = arith.addf %381, %402 : vector<2x8x32xf32>
    %c7_i32_65 = arith.constant 7 : i32
    %404 = vector.broadcast %c7_i32_65 : i32 to vector<1x8x1xi32>
    %405 = arith.cmpi eq, %247, %404 : vector<1x8x1xi32>
    %406 = vector.extract_strided_slice %246 {offsets = [0, 0], sizes = [2, 32], strides = [1, 1]} : vector<2x64xf32> to vector<2x32xf32>
    %407 = vector.shape_cast %406 : vector<2x32xf32> to vector<2x1x32xf32>
    %cst_66 = arith.constant 0.000000e+00 : f32
    %408 = vector.shape_cast %405 : vector<1x8x1xi1> to vector<1x8x1xi1>
    %409 = vector.broadcast %408 : vector<1x8x1xi1> to vector<2x8x32xi1>
    %410 = vector.shape_cast %407 : vector<2x1x32xf32> to vector<2x1x32xf32>
    %411 = vector.broadcast %410 : vector<2x1x32xf32> to vector<2x8x32xf32>
    %412 = vector.broadcast %cst_66 : f32 to vector<2x8x32xf32>
    %413 = arith.select %409, %411, %412 : vector<2x8x32xi1>, vector<2x8x32xf32>
    %414 = arith.addf %392, %413 : vector<2x8x32xf32>
    %c0_i32_67 = arith.constant 0 : i32
    %415 = vector.broadcast %c0_i32_67 : i32 to vector<1x8x1xi32>
    %416 = arith.cmpi eq, %247, %415 : vector<1x8x1xi32>
    %417 = vector.extract_strided_slice %246 {offsets = [0, 32], sizes = [2, 32], strides = [1, 1]} : vector<2x64xf32> to vector<2x32xf32>
    %418 = vector.shape_cast %417 : vector<2x32xf32> to vector<2x1x32xf32>
    %cst_68 = arith.constant 0.000000e+00 : f32
    %419 = vector.shape_cast %416 : vector<1x8x1xi1> to vector<1x8x1xi1>
    %420 = vector.broadcast %419 : vector<1x8x1xi1> to vector<2x8x32xi1>
    %421 = vector.shape_cast %418 : vector<2x1x32xf32> to vector<2x1x32xf32>
    %422 = vector.broadcast %421 : vector<2x1x32xf32> to vector<2x8x32xf32>
    %423 = vector.broadcast %cst_68 : f32 to vector<2x8x32xf32>
    %424 = arith.select %420, %422, %423 : vector<2x8x32xi1>, vector<2x8x32xf32>
    %425 = arith.addf %403, %424 : vector<2x8x32xf32>
    %426 = tpu.concatenate %414, %425 in 2 : vector<2x8x32xf32>, vector<2x8x32xf32> -> vector<2x8x64xf32>
    %427 = vector.shape_cast %1 : vector<2x8xf32> to vector<2x8x1xf32>
    %428 = vector.broadcast %427 : vector<2x8x1xf32> to vector<2x8x64xf32>
    %429 = arith.mulf %426, %428 : vector<2x8x64xf32>
    %430 = vector.shape_cast %429 : vector<2x8x64xf32> to vector<16x64xf32>
    %431 = arith.truncf %430 : vector<16x64xf32> to vector<16x64xbf16>
    %c0_69 = arith.constant 0 : index
    %c0_70 = arith.constant 0 : index
    %432 = vector.load %arg5[%c0_69, %c0_70] : memref<64x128xbf16, #tpu.memory_space<vmem>>, vector<64x128xbf16>
    %cst_71 = arith.constant dense<0.000000e+00> : vector<16x128xf32>
    %433 = tpu.matmul %431, %432, %cst_71 {dimension_numbers = #tpu.dot_dimension_numbers<[1], [0], [0], [1], [0, 0, 1, 1], [], []>} : vector<16x64xbf16>, vector<64x128xbf16>, vector<16x128xf32> -> vector<16x128xf32>
    %c0_72 = arith.constant 0 : index
    %c0_73 = arith.constant 0 : index
    %434 = vector.load %arg6[%c0_72, %c0_73] : memref<1x128xf32, #tpu.memory_space<vmem>>, vector<1x128xf32>
    %435 = vector.broadcast %434 : vector<1x128xf32> to vector<16x128xf32>
    %436 = arith.addf %433, %435 : vector<16x128xf32>
    %437 = vector.extract_strided_slice %436 {offsets = [0, 0], sizes = [16, 64], strides = [1, 1]} : vector<16x128xf32> to vector<16x64xf32>
    %438 = vector.shape_cast %437 : vector<16x64xf32> to vector<2x8x64xf32>
    %439 = vector.extract_strided_slice %436 {offsets = [0, 64], sizes = [16, 64], strides = [1, 1]} : vector<16x128xf32> to vector<16x64xf32>
    %440 = vector.shape_cast %439 : vector<16x64xf32> to vector<2x8x64xf32>
    %441 = vector.extract_strided_slice %438 {offsets = [0, 0, 0], sizes = [2, 8, 32], strides = [1, 1, 1]} : vector<2x8x64xf32> to vector<2x8x32xf32>
    %442 = arith.truncf %441 : vector<2x8x32xf32> to vector<2x8x32xbf16>
    %443 = vector.extract_strided_slice %440 {offsets = [0, 0, 0], sizes = [2, 8, 32], strides = [1, 1, 1]} : vector<2x8x64xf32> to vector<2x8x32xf32>
    %444 = arith.truncf %443 : vector<2x8x32xf32> to vector<2x8x32xbf16>
    "tpu.trace_start"() <{level = 10 : i32, message = "bqd,bkd->bqk"}> : () -> ()
    %cst_74 = arith.constant dense<0.000000e+00> : vector<2x8x8xf32>
    %445 = tpu.matmul %442, %444, %cst_74 {dimension_numbers = #tpu.dot_dimension_numbers<[2], [2], [1], [1], [0, 0, 0, 1, 1, 1], [0], [0]>} : vector<2x8x32xbf16>, vector<2x8x32xbf16>, vector<2x8x8xf32> -> vector<2x8x8xf32>
    "tpu.trace_stop"() : () -> ()
    %446 = vector.extract_strided_slice %438 {offsets = [0, 0, 32], sizes = [2, 8, 32], strides = [1, 1, 1]} : vector<2x8x64xf32> to vector<2x8x32xf32>
    %447 = arith.truncf %446 : vector<2x8x32xf32> to vector<2x8x32xbf16>
    %448 = vector.extract_strided_slice %440 {offsets = [0, 0, 32], sizes = [2, 8, 32], strides = [1, 1, 1]} : vector<2x8x64xf32> to vector<2x8x32xf32>
    %449 = arith.truncf %448 : vector<2x8x32xf32> to vector<2x8x32xbf16>
    "tpu.trace_start"() <{level = 10 : i32, message = "bqd,bkd->bqk"}> : () -> ()
    %cst_75 = arith.constant dense<0.000000e+00> : vector<2x8x8xf32>
    %450 = tpu.matmul %447, %449, %cst_75 {dimension_numbers = #tpu.dot_dimension_numbers<[2], [2], [1], [1], [0, 0, 0, 1, 1, 1], [0], [0]>} : vector<2x8x32xbf16>, vector<2x8x32xbf16>, vector<2x8x8xf32> -> vector<2x8x8xf32>
    "tpu.trace_stop"() : () -> ()
    %451 = vector.shape_cast %445 : vector<2x8x8xf32> to vector<1x2x8x8xf32>
    %452 = vector.shape_cast %450 : vector<2x8x8xf32> to vector<1x2x8x8xf32>
    %453 = tpu.concatenate %451, %452 in 0 : vector<1x2x8x8xf32>, vector<1x2x8x8xf32> -> vector<2x2x8x8xf32>
    %cst_76 = arith.constant 0.176776692 : f32
    %454 = vector.broadcast %cst_76 : f32 to vector<2x2x8x8xf32>
    %455 = arith.mulf %453, %454 : vector<2x2x8x8xf32>
    %456 = vector.shape_cast %5 : vector<2x8xf32> to vector<2x1x8xf32>
    %cst_77 = arith.constant 0.000000e+00 : f32
    %457 = vector.broadcast %cst_77 : f32 to vector<2x1x8xf32>
    %458 = arith.cmpf oeq, %456, %457 : vector<2x1x8xf32>
    %cst_78 = arith.constant -1.000000e+09 : f32
    %459 = vector.shape_cast %458 : vector<2x1x8xi1> to vector<1x2x1x8xi1>
    %460 = vector.broadcast %459 : vector<1x2x1x8xi1> to vector<2x2x8x8xi1>
    %461 = vector.broadcast %cst_78 : f32 to vector<2x2x8x8xf32>
    %462 = arith.select %460, %461, %455 : vector<2x2x8x8xi1>, vector<2x2x8x8xf32>
    %cst_79 = arith.constant dense<0xFF800000> : vector<2x2x8xf32>
    %463 = vector.multi_reduction <maximumf>, %462, %cst_79 [3] : vector<2x2x8x8xf32> to vector<2x2x8xf32>
    %464 = vector.shape_cast %463 : vector<2x2x8xf32> to vector<2x2x8x1xf32>
    %465 = vector.broadcast %464 : vector<2x2x8x1xf32> to vector<2x2x8x8xf32>
    %466 = arith.subf %462, %465 : vector<2x2x8x8xf32>
    %467 = math.exp %466 : vector<2x2x8x8xf32>
    %cst_80 = arith.constant dense<0.000000e+00> : vector<2x2x8xf32>
    %468 = vector.multi_reduction <add>, %467, %cst_80 [3] : vector<2x2x8x8xf32> to vector<2x2x8xf32>
    %469 = vector.shape_cast %468 : vector<2x2x8xf32> to vector<2x2x8x1xf32>
    %470 = tpu.reciprocal %469 {approx = true} : vector<2x2x8x1xf32> -> vector<2x2x8x1xf32>
    %471 = vector.broadcast %470 : vector<2x2x8x1xf32> to vector<2x2x8x8xf32>
    %472 = arith.mulf %467, %471 : vector<2x2x8x8xf32>
    %cst_81 = arith.constant dense<0.000000e+00> : vector<2x8x8xf32>
    %473 = vector.multi_reduction <add>, %472, %cst_81 [0] : vector<2x2x8x8xf32> to vector<2x8x8xf32>
    %cst_82 = arith.constant 5.000000e-01 : f32
    %474 = vector.broadcast %cst_82 : f32 to vector<2x8x8xf32>
    %475 = arith.mulf %473, %474 : vector<2x8x8xf32>
    %476 = tpu.iota {dimensions = array<i32: 0>} : vector<8x8xi32>
    %477 = tpu.iota {dimensions = array<i32: 1>} : vector<8x8xi32>
    %478 = arith.cmpi eq, %476, %477 : vector<8x8xi32>
    %479 = vector.shape_cast %478 : vector<8x8xi1> to vector<1x8x8xi1>
    %cst_83 = arith.constant 1.000000e+00 : f32
    %480 = vector.shape_cast %479 : vector<1x8x8xi1> to vector<1x8x8xi1>
    %481 = vector.broadcast %480 : vector<1x8x8xi1> to vector<2x8x8xi1>
    %482 = vector.broadcast %cst_83 : f32 to vector<2x8x8xf32>
    %483 = arith.select %481, %482, %475 : vector<2x8x8xi1>, vector<2x8x8xf32>
    %484 = vector.shape_cast %5 : vector<2x8xf32> to vector<2x8x1xf32>
    %485 = vector.broadcast %484 : vector<2x8x1xf32> to vector<2x8x8xf32>
    %486 = arith.mulf %483, %485 : vector<2x8x8xf32>
    %cst_84 = arith.constant dense<0.000000e+00> : vector<2x8xf32>
    %487 = vector.multi_reduction <add>, %486, %cst_84 [2] : vector<2x8x8xf32> to vector<2x8xf32>
    %488 = vector.shape_cast %487 : vector<2x8xf32> to vector<2x8x1xf32>
    %cst_85 = arith.constant 1.000000e+00 : f32
    %489 = vector.broadcast %cst_85 : f32 to vector<2x8x1xf32>
    %490 = arith.addf %488, %489 : vector<2x8x1xf32>
    %cst_86 = arith.constant 1.000000e+00 : f32
    %491 = vector.broadcast %cst_86 : f32 to vector<2x8x1xf32>
    %492 = arith.divf %491, %490 : vector<2x8x1xf32>
    %493 = arith.truncf %486 : vector<2x8x8xf32> to vector<2x8x8xbf16>
    %494 = vector.shape_cast %429 : vector<2x8x64xf32> to vector<16x64xf32>
    %495 = arith.truncf %494 : vector<16x64xf32> to vector<16x64xbf16>
    %c0_87 = arith.constant 0 : index
    %c0_88 = arith.constant 0 : index
    %496 = vector.load %arg7[%c0_87, %c0_88] : memref<64x32xbf16, #tpu.memory_space<vmem>>, vector<64x32xbf16>
    %cst_89 = arith.constant dense<0.000000e+00> : vector<16x32xf32>
    %497 = tpu.matmul %495, %496, %cst_89 {dimension_numbers = #tpu.dot_dimension_numbers<[1], [0], [0], [1], [0, 0, 1, 1], [], []>} : vector<16x64xbf16>, vector<64x32xbf16>, vector<16x32xf32> -> vector<16x32xf32>
    %498 = vector.shape_cast %497 : vector<16x32xf32> to vector<2x8x32xf32>
    %499 = arith.truncf %498 : vector<2x8x32xf32> to vector<2x8x32xbf16>
    "tpu.trace_start"() <{level = 10 : i32, message = "bij,bjd->bid"}> : () -> ()
    %cst_90 = arith.constant dense<0.000000e+00> : vector<2x8x32xf32>
    %500 = tpu.matmul %493, %499, %cst_90 {dimension_numbers = #tpu.dot_dimension_numbers<[2], [1], [1], [2], [0, 0, 0, 1, 1, 2], [0], [0]>} : vector<2x8x8xbf16>, vector<2x8x32xbf16>, vector<2x8x32xf32> -> vector<2x8x32xf32>
    "tpu.trace_stop"() : () -> ()
    %c0_91 = arith.constant 0 : index
    %c0_92 = arith.constant 0 : index
    %501 = vector.load %arg8[%c0_91, %c0_92] : memref<1x32xf32, #tpu.memory_space<vmem>>, vector<1x32xf32>
    %502 = vector.shape_cast %501 : vector<1x32xf32> to vector<1x1x32xf32>
    %503 = vector.broadcast %502 : vector<1x1x32xf32> to vector<2x8x32xf32>
    %504 = arith.addf %500, %503 : vector<2x8x32xf32>
    %505 = vector.broadcast %492 : vector<2x8x1xf32> to vector<2x8x32xf32>
    %506 = arith.mulf %504, %505 : vector<2x8x32xf32>
    %cst_93 = arith.constant 0.000000e+00 : f32
    %507 = vector.broadcast %cst_93 : f32 to vector<2x8x32xf32>
    %508 = arith.maximumf %506, %507 : vector<2x8x32xf32>
    %509 = vector.shape_cast %508 : vector<2x8x32xf32> to vector<16x32xf32>
    %510 = arith.truncf %509 : vector<16x32xf32> to vector<16x32xbf16>
    %c0_94 = arith.constant 0 : index
    %c0_95 = arith.constant 0 : index
    %511 = vector.load %arg9[%c0_94, %c0_95] : memref<32x32xbf16, #tpu.memory_space<vmem>>, vector<32x32xbf16>
    %cst_96 = arith.constant dense<0.000000e+00> : vector<16x32xf32>
    %512 = tpu.matmul %510, %511, %cst_96 {dimension_numbers = #tpu.dot_dimension_numbers<[1], [0], [0], [1], [0, 0, 1, 1], [], []>} : vector<16x32xbf16>, vector<32x32xbf16>, vector<16x32xf32> -> vector<16x32xf32>
    %513 = vector.shape_cast %512 : vector<16x32xf32> to vector<2x8x32xf32>
    %514 = arith.truncf %513 : vector<2x8x32xf32> to vector<2x8x32xbf16>
    "tpu.trace_start"() <{level = 10 : i32, message = "bij,bjd->bid"}> : () -> ()
    %cst_97 = arith.constant dense<0.000000e+00> : vector<2x8x32xf32>
    %515 = tpu.matmul %493, %514, %cst_97 {dimension_numbers = #tpu.dot_dimension_numbers<[2], [1], [1], [2], [0, 0, 0, 1, 1, 2], [0], [0]>} : vector<2x8x8xbf16>, vector<2x8x32xbf16>, vector<2x8x32xf32> -> vector<2x8x32xf32>
    "tpu.trace_stop"() : () -> ()
    %c0_98 = arith.constant 0 : index
    %c0_99 = arith.constant 0 : index
    %516 = vector.load %arg10[%c0_98, %c0_99] : memref<1x32xf32, #tpu.memory_space<vmem>>, vector<1x32xf32>
    %517 = vector.shape_cast %516 : vector<1x32xf32> to vector<1x1x32xf32>
    %518 = vector.broadcast %517 : vector<1x1x32xf32> to vector<2x8x32xf32>
    %519 = arith.addf %515, %518 : vector<2x8x32xf32>
    %520 = vector.broadcast %492 : vector<2x8x1xf32> to vector<2x8x32xf32>
    %521 = arith.mulf %519, %520 : vector<2x8x32xf32>
    %cst_100 = arith.constant 0.000000e+00 : f32
    %522 = vector.broadcast %cst_100 : f32 to vector<2x8x32xf32>
    %523 = arith.maximumf %521, %522 : vector<2x8x32xf32>
    %524 = vector.shape_cast %7 : vector<2x8xf32> to vector<2x8x1xf32>
    %cst_101 = arith.constant dense<0.000000e+00> : vector<2x1xf32>
    %525 = vector.multi_reduction <add>, %524, %cst_101 [1] : vector<2x8x1xf32> to vector<2x1xf32>
    %526 = vector.broadcast %524 : vector<2x8x1xf32> to vector<2x8x32xf32>
    %527 = arith.mulf %523, %526 : vector<2x8x32xf32>
    %cst_102 = arith.constant dense<0.000000e+00> : vector<2x32xf32>
    %528 = vector.multi_reduction <add>, %527, %cst_102 [1] : vector<2x8x32xf32> to vector<2x32xf32>
    %529 = vector.broadcast %525 : vector<2x1xf32> to vector<2x32xf32>
    %530 = arith.divf %528, %529 : vector<2x32xf32>
    %531 = arith.truncf %530 : vector<2x32xf32> to vector<2x32xbf16>
    %c0_103 = arith.constant 0 : index
    %c0_104 = arith.constant 0 : index
    %532 = vector.load %arg11[%c0_103, %c0_104] : memref<32x3xbf16, #tpu.memory_space<vmem>>, vector<32x3xbf16>
    %cst_105 = arith.constant dense<0.000000e+00> : vector<2x3xf32>
    %533 = tpu.matmul %531, %532, %cst_105 {dimension_numbers = #tpu.dot_dimension_numbers<[1], [0], [0], [1], [0, 0, 1, 1], [], []>} : vector<2x32xbf16>, vector<32x3xbf16>, vector<2x3xf32> -> vector<2x3xf32>
    %c0_106 = arith.constant 0 : index
    %c0_107 = arith.constant 0 : index
    %534 = vector.load %arg12[%c0_106, %c0_107] : memref<1x3xf32, #tpu.memory_space<vmem>>, vector<1x3xf32>
    %535 = vector.broadcast %534 : vector<1x3xf32> to vector<2x3xf32>
    %536 = arith.addf %533, %535 : vector<2x3xf32>
    %c0_108 = arith.constant 0 : index
    %c0_109 = arith.constant 0 : index
    %537 = vector.load %arg13[%c0_108, %c0_109] : memref<2x3xf32, #tpu.memory_space<vmem>>, vector<2x3xf32>
    tpu.vector_store %arg13[%c0_108, %c0_109], %536 {strides = array<i32>} : memref<2x3xf32, #tpu.memory_space<vmem>>, vector<2x3xf32>,
    return
  }
}

</mosaic_0001>

<bundles_post_ra>
// kernel: semgcn_forward.1
= control target key start
LH: loop header
LB: loop body
LE: loop exit
PB: predicated region body
PF: predicated region fallthrough
CT: control target
= control target key end

     0   :  { %v3018_v2 = vmov 0   ;;  %vm116_vm0 = vcmask 523264   ;;  %s4029_s0 = inlined_call_operand.vmem [shape: f32[2,8,64], index: 0, kind: input, shape index: {}]   ;;  %s4030_s1 = inlined_call_operand.vmem [shape: f32[4,2,8], index: 1, kind: input, shape index: {}]   ;;  %s4031_s2 = inlined_call_operand.vmem [shape: bf16[64,256], index: 2, kind: input, shape index: {}]   ;;  %s4032_s3 = inlined_call_operand.vmem [shape: bf16[64,256], index: 3, kind: input, shape index: {}]   ;;  %s4033_s4 = inlined_call_operand.vmem [shape: f32[1,256], index: 4, kind: input, shape index: {}]   ;;  %s4034_s5 = inlined_call_operand.vmem [shape: bf16[64,128], index: 5, kind: input, shape index: {}]   ;;  %s4035_s6 = inlined_call_operand.vmem [shape: f32[1,128], index: 6, kind: input, shape index: {}]   ;;  %s4036_s7 = inlined_call_operand.vmem [shape: bf16[64,32], index: 7, kind: input, shape index: {}]   ;;  %s4037_s8 = inlined_call_operand.vmem [shape: f32[1,32], index: 8, kind: input, shape index: {}]   ;;  %s4038_s9 = inlined_call_operand.vmem [shape: bf16[32,32], index: 9, kind: input, shape index: {}]   ;;  %s4039_s10 = inlined_call_operand.vmem [shape: f32[1,32], index: 10, kind: input, shape index: {}]   ;;  %s4040_s11 = inlined_call_operand.vmem [shape: bf16[32,3], index: 11, kind: input, shape index: {}]   ;;  %s4041_s12 = inlined_call_operand.vmem [shape: f32[1,3], index: 12, kind: input, shape index: {}]   ;;  %s4042_s13 = inlined_call_operand.hbm [shape: f32[2,3], index: 13, kind: output, shape index: {}]  }
   0x1   :  { %v2735_v0 = vld [vmem:[%s4031_s2 + $0x4] ss:$8 sps:$4 sm:$0xff]   ;;  %152 = vmatprep.mubr.bf16.mxu0 %v3018_v2  ;;  %281 = vmatprep.mubr.bf16.mxu1 %v3018_v2  ;;  %v2739_v3 = vld [vmem:[%s4031_s2] ss:$8 sps:$4 sm:$0xff]   ;;  %v2741_v5 = vld [vmem:[%s4031_s2 + $0x14] ss:$8 sps:$4 sm:$0xff]  }
   0x2   :  { %v3102_v1 = vld [vmem:[%s4032_s3 + $0x4] ss:$8 sps:$4 sm:$0xff]   ;;  %120 = vmatprep.subr.bf16.mxu0 %v2735_v0  ;;  %v3112_v4 = vld [vmem:[%s4032_s3] ss:$8 sps:$4 sm:$0xff]   ;;  %v3122_v6 = vld [vmem:[%s4032_s3 + $0x14] ss:$8 sps:$4 sm:$0xff]  }
   0x3   :  { %249 = vmatprep.subr.bf16.mxu1 %v3102_v1  ;;  %121 = vmatpush1.bf16.msra.mxu0 %v2739_v3  ;;  %v2745_v7 = vld [vmem:[%s4031_s2 + $0x10] ss:$8 sps:$4 sm:$0xff]   ;;  %v2747_v9 = vld [vmem:[%s4031_s2 + $0x24] ss:$8 sps:$4 sm:$0xff]   ;;  %v2751_v11 = vld [vmem:[%s4031_s2 + $0x20] ss:$8 sps:$4 sm:$0xff]  }
   0x4   :  { %250 = vmatpush1.bf16.msra.mxu1 %v3112_v4  ;;  %122 = vmatprep.subr.bf16.mxu0 %v2741_v5  ;;  %v3130_v8 = vld [vmem:[%s4032_s3 + $0x10] ss:$8 sps:$4 sm:$0xff]   ;;  %v3139_v10 = vld [vmem:[%s4032_s3 + $0x24] ss:$8 sps:$4 sm:$0xff]   ;;  %v3147_v12 = vld [vmem:[%s4032_s3 + $0x20] ss:$8 sps:$4 sm:$0xff]  }
   0x5   :  { %251 = vmatprep.subr.bf16.mxu1 %v3122_v6  ;;  %v2753_v13 = vld [vmem:[%s4031_s2 + $0x34] ss:$8 sps:$4 sm:$0xff]   ;;  %v2757_v15 = vld [vmem:[%s4031_s2 + $0x30] ss:$8 sps:$4 sm:$0xff]   ;;  %v53_v17 = vld [vmem:[%s4029_s0] sm:$0xff] }
   0x6   :  { %v3157_v14 = vld [vmem:[%s4032_s3 + $0x34] ss:$8 sps:$4 sm:$0xff]   ;;  %v3165_v16 = vld [vmem:[%s4032_s3 + $0x30] ss:$8 sps:$4 sm:$0xff]   ;;  %v54_v18 = vld [vmem:[%s4029_s0 + $0x8] sm:$0xff] }
   0x7   :  { %123 = vmatpush1.bf16.msra.mxu0 %v2745_v7  ;;  %v55_v19 = vpack.c.bf16 %v54_v18, %v53_v17 }
   0x8   :  { %252 = vmatpush1.bf16.msra.mxu1 %v3130_v8  ;;  %124 = vmatprep.subr.bf16.mxu0 %v2747_v9 }
   0x9   :  { %253 = vmatprep.subr.bf16.mxu1 %v3139_v10 }
   0xb   :  { %125 = vmatpush1.bf16.msra.mxu0 %v2751_v11 }
   0xc   :  { %254 = vmatpush1.bf16.msra.mxu1 %v3147_v12  ;;  %126 = vmatprep.subr.bf16.mxu0 %v2753_v13 }
   0xd   :  { %255 = vmatprep.subr.bf16.mxu1 %v3157_v14 }
   0xf   :  { %127 = vmatpush1.bf16.msra.mxu0 %v2757_v15 }
  0x10   :  { %256 = vmatpush1.bf16.msra.mxu1 %v3165_v16  ;;  %389 = vmatprep.subr.bf16.mxu0 %v3102_v1 }
  0x11   :  { %544 = vmatprep.subr.bf16.mxu1 %v3102_v1 }
  0x12   :  { %2531 = vmatmul.mubr.msk.bf16.vlgmr.msra.gmra.mrb[0].mxu0 %vm116_vm0, %v55_v19 }
  0x13   :  { %282 = vmatmul.mubr.bf16.vlgmr.msra.gmra.mrb[0].mxu1 %v3018_v2 }
  0x14   :  { %18 = vsyncpa [#allocation3], 0  ;;  %390 = vmatpush1.bf16.msra.mxu0 %v3112_v4  ;;  %421 = vmatprep.mubr.bf16.mxu0 %v3018_v2  ;;  %v66_v20 = vlaneseq  ;;  %v64_v23 = vld [vmem:[%s4033_s4] sm:$0x3]  ;;  %s3019_s4 = smov 64   ;;  %vm383_vm4 = vcmask 1041409  }
  0x15   :  { %391 = vmatprep.subr.bf16.mxu0 %v3122_v6  ;;  %545 = vmatpush1.bf16.msra.mxu1 %v3112_v4  ;;  %v46_v53 = vld [vmem:[%s4030_s1] sm:$0x3]  ;;  %v2520_v60 = vld [vmem:[%s4030_s1 + $0x2] sm:$0x3]  ;;  %vm3021_vm13 = vmmov 0   ;;  %vm1621_vm14 = vcmask 261120  }
  0x16   :  { %546 = vmatprep.subr.bf16.mxu1 %v3122_v6  ;;  %576 = vmatprep.mubr.bf16.mxu1 %v3018_v2  ;;  %v3199_v21 = vshrl.u32 %v66_v20, 7  ;;  %s3022_s17 = smov 32   ;;  %s3023_s18 = smov 96  }
  0x17   :  { %s3025_s16 = smov [#allocation2]  }
  0x18   :  { %392 = vmatpush1.bf16.msra.mxu0 %v3130_v8  ;;  %v3202_v22 = vsub.s32 1, %v3199_v21  ;;  %v3217_v40 = vsub.s32 0, %v3199_v21  ;;  %vm1469_vm5 = vcmp.eq.s32.totalorder %v3199_v21, 0  ;;  %vm1484_vm6 = vcmp.eq.s32.totalorder %v3199_v21, 7 }
  0x19   :  { %393 = vmatprep.subr.bf16.mxu0 %v3139_v10  ;;  %547 = vmatpush1.bf16.msra.mxu1 %v3130_v8  ;;  %vm1491_vm7 = vcmp.eq.s32.totalorder %v3199_v21, 1  ;;  %vm1506_vm8 = vcmp.eq.s32.totalorder %v3199_v21, 6  ;;  %vm1513_vm9 = vcmp.eq.s32.totalorder %v3199_v21, 2  ;;  %vm1528_vm10 = vcmp.eq.s32.totalorder %v3199_v21, 5 }
  0x1a   :  { %548 = vmatprep.subr.bf16.mxu1 %v3139_v10  ;;  %v73_v26 = vrot.slane %v64_v23, %v3202_v22  ;;  %v69_v41 = vrot.slane %v64_v23, %v3217_v40  ;;  %v184_v54 = vrot.slane %v46_v53, %v3202_v22  ;;  %v198_v62 = vrot.slane %v2520_v60, %v3202_v22 }
  0x1b   :  { %v177_v63 = vrot.slane %v46_v53, %v3217_v40  ;;  %v191_v15 = vrot.slane %v2520_v60, %v3217_v40  ;;  %vm1535_vm11 = vcmp.eq.s32.totalorder %v3199_v21, 3  ;;  %vm1550_vm12 = vcmp.eq.s32.totalorder %v3199_v21, 4 }
  0x1c   :  { %394 = vmatpush1.bf16.msra.mxu0 %v3147_v12 }
  0x1d   :  { %395 = vmatprep.subr.bf16.mxu0 %v3157_v14  ;;  %549 = vmatpush1.bf16.msra.mxu1 %v3147_v12 }
  0x1e   :  { %550 = vmatprep.subr.bf16.mxu1 %v3157_v14 }
  0x20   :  { %396 = vmatpush1.bf16.msra.mxu0 %v3165_v16 }
  0x21   :  { %551 = vmatpush1.bf16.msra.mxu1 %v3165_v16  ;;  %702 = vmatprep.subr.bf16.mxu0 %v3102_v1 }
  0x22   :  { %860 = vmatprep.subr.bf16.mxu1 %v3102_v1 }
  0xe5   :  { %v154_v24 = vpop.f32.mrb[0].mxu0 }
  0xe6   :  { %v283_v25 = vpop.f32.mrb[0].mxu1  ;;  %v156_v27 = vpop.f32.mrb[1].mxu0  ;;  %v3222_v44 = vadd.f32 %v154_v24, %v69_v41 }
  0xe7   :  { %v285_v28 = vpop.f32.mrb[1].mxu1  ;;  %v158_v30 = vpop.f32.mrb[2].mxu0  ;;  %v3210_v35 = vadd.f32 %v156_v27, %v73_v26  ;;  %v292_v42 = vrot.slane %v283_v25, 1 }
  0xe8   :  { %v293_v29 = vrot.slane %v285_v28, 1  ;;  %v287_v31 = vpop.f32.mrb[2].mxu1  ;;  %v160_v32 = vpop.f32.mrb[3].mxu0  ;;  %v3220_v43 = vadd.f32 %v158_v30, %v69_v41  ;;  %v298_v46 = vadd.f32 %v283_v25, %v3222_v44 }
  0xe9   :  { %v288_v33 = vpop.f32.mrb[3].mxu1  ;;  %v3208_v34 = vadd.f32 %v160_v32, %v73_v26  ;;  %v299_v37 = vadd.f32 %v285_v28, %v3210_v35  ;;  %v3243_v28 = vand.u32 127, %v66_v20 }
  0xea   :  { %v300_v45 = vadd.f32 %v292_v42, %v3220_v43  ;;  %v2540_v48 = vmul.f32 -1.442695, %v298_v46 }
  0xeb   :  { %v301_v36 = vadd.f32 %v293_v29, %v3208_v34  ;;  %v2541_v19 = vmul.f32 -1.442695, %v299_v37  ;;  %vm173_vm1 = vcmp.lt.s32.totalorder %v3243_v28, 32 }
  0xec   :  { %v2542_v47 = vmul.f32 -1.442695, %v300_v45 }
  0xed   :  { %2771 = vtanh.f32 %v301_v36  ;;  %v2543_v18 = vmul.f32 -1.442695, %v301_v36 }
  0xee   :  { %2773 = vtanh.f32 %v299_v37 }
  0xef   :  { %2775 = vpow2.f32 %v2542_v47 }
  0xf0   :  { %2777 = vpow2.f32 %v2540_v48 }
  0xf7   :  { %v2772_v38 = vpop.eup %2771 }
  0xf8   :  { %334 = vrot.lane.b32.xlu0 %v2772_v38, %s3019_s4  ;;  %v2774_v39 = vpop.eup %2773 }
  0xf9   :  { %v2776_v49 = vpop.eup %2775 }
  0xfa   :  { %v316_v50 = vadd.f32 1.0, %v2776_v49  ;;  %v2778_v51 = vpop.eup %2777 }
  0xfb   :  { %v314_v52 = vadd.f32 1.0, %v2778_v51 }
  0xfc   :  { %332 = vrot.lane.b32.xlu0 %v2774_v39, %s3019_s4  ;;  %2779 = vrcp.f32 %v316_v50 }
  0xfd   :  { %2781 = vrcp.f32 %v314_v52 }
 0x100   :  { %186 = vbcast.lane.b32.xlu0 %v184_v54, 256 }
 0x106   :  { %v2780_v55 = vpop.eup %2779 }
 0x107   :  { %v2782_v58 = vpop.eup %2781  ;;  %v329_v0 = vmul.f32 0.0, %v2780_v55 }
 0x108   :  { %v328_v7 = vmul.f32 0.0, %v2782_v58 }
 0x16a   :  { %v335_v56 = vpop.permute.xlu0 %334 }
 0x16b   :  { %v339_v57 = vmul.f32 %v2780_v55, %v335_v56 }
 0x16d   :  { %344 = vrot.lane.b32.xlu1 %v339_v57, %s3019_s4 }
 0x16e   :  { %v333_v59 = vpop.permute.xlu0 %332 }
 0x16f   :  { %v338_v61 = vmul.f32 %v2782_v58, %v333_v59 }
 0x171   :  { %342 = vrot.lane.b32.xlu1 %v338_v61, %s3019_s4 }
 0x172   :  { %v3245_v29 = vpop.permute.xlu0 %186 }
 0x175   :  { %200 = vbcast.lane.b32.xlu1 %v198_v62, 256 }
 0x179   :  { %179 = vbcast.lane.b32.xlu1 %v177_v63, 256 }
 0x1df   :  { %v345_v3 = vpop.permute.xlu1 %344 }
 0x1e0   :  { %v349_v5 = vadd.f32 %v345_v3, %v329_v0 }
 0x1e2   :  { %2783 = vtanh.f32 %v349_v5 }
 0x1e3   :  { %v343_v9 = vpop.permute.xlu1 %342 }
 0x1e4   :  { %v348_v11 = vadd.f32 %v343_v9, %v328_v7 }
 0x1e6   :  { %2785 = vtanh.f32 %v348_v11 }
 0x1e7   :  { %2787 = vpow2.f32 %v2543_v18  ;;  %v201_v27 = vpop.permute.xlu1 %200 }
 0x1e8   :  { %2789 = vpow2.f32 %v2541_v19  ;;  %v3251_v31 = vsel %vm173_vm1, %v3245_v29, %v201_v27 }
 0x1e9   :  { %vm363_vm2 = vcmp.gt.f32.partialorder %v3251_v31, 0.0 }
 0x1eb   :  { %v3248_v30 = vpop.permute.xlu1 %179 }
 0x1ec   :  { %v2784_v13 = vpop.eup %2783 }
 0x1ed   :  { %356 = vrot.lane.b32.xlu0 %v2784_v13, %s3019_s4 }
 0x1f0   :  { %v2786_v17 = vpop.eup %2785 }
 0x1f1   :  { %193 = vbcast.lane.b32.xlu0 %v191_v15, 256  ;;  %354 = vrot.lane.b32.xlu1 %v2786_v17, %s3019_s4  ;;  %v2788_v23 = vpop.eup %2787 }
 0x1f2   :  { %v317_v24 = vadd.f32 1.0, %v2788_v23  ;;  %v2790_v25 = vpop.eup %2789 }
 0x1f3   :  { %v315_v26 = vadd.f32 1.0, %v2790_v25 }
 0x1f4   :  { %2791 = vrcp.f32 %v317_v24 }
 0x1f5   :  { %366 = vrot.lane.b32.xlu0 %v348_v11, %s3019_s4  ;;  %368 = vrot.lane.b32.xlu1 %v349_v5, %s3019_s4  ;;  %2793 = vrcp.f32 %v315_v26 }
 0x1fe   :  { %v2792_v32 = vpop.eup %2791 }
 0x1ff   :  { %v2794_v20 = vpop.eup %2793 }
 0x25f   :  { %v357_v33 = vpop.permute.xlu0 %356 }
 0x260   :  { %v361_v36 = vmul.f32 %v2792_v32, %v357_v33 }
 0x262   :  { %v3256_v37 = vsel %vm363_vm2, %v361_v36, 0.0 }
 0x263   :  { %v377_v38 = vpack.c.bf16 %v3256_v37, %v3256_v37  ;;  %v194_v39 = vpop.permute.xlu0 %193  ;;  %v355_v41 = vpop.permute.xlu1 %354 }
 0x264   :  { %v3261_v42 = vsel %vm173_vm1, %v3248_v30, %v194_v39  ;;  %v360_v45 = vmul.f32 %v2794_v20, %v355_v41 }
 0x265   :  { %v381_v46 = vunpack.c.l.b16 %v377_v38  ;;  %vm362_vm3 = vcmp.gt.f32.partialorder %v3261_v42, 0.0 }
 0x266   :  { %v3266_v47 = vsel %vm362_vm3, %v360_v45, 0.0 }
 0x267   :  { %v376_v48 = vpack.c.bf16 %v3266_v47, %v3266_v47  ;;  %v382_v49 = vrot.slane %v381_v46, 7  ;;  %v369_v60 = vpop.permute.xlu1 %368  ;;  %v367_v63 = vpop.permute.xlu0 %366 }
 0x268   :  { %v3285_v62 = vsel %vm363_vm2, %v369_v60, 0.0  ;;  %v3291_v5 = vsel %vm362_vm3, %v367_v63, 0.0  ;;  %v527_v63 = vrot.slane %v3256_v37, 7 }
 0x269   :  { %v380_v50 = vunpack.c.l.b16 %v376_v48  ;;  %v471_v0 = vrot.slane %v3285_v62, 7  ;;  %v470_v7 = vrot.slane %v3291_v5, 7 }
 0x26b   :  { %v384_v51 = vsel %vm383_vm4, %v382_v49, %v380_v50 }
 0x26c   :  { %v385_v52 = vpack.c.b16 %v384_v51, %v384_v51 }
 0x26e   :  { %2544 = vmatmul.mubr.msk.bf16.vlgmr.msra.gmra.mrb[4].mxu0 %vm116_vm0, %v385_v52 }
 0x26f   :  { %703 = vmatpush1.bf16.msra.mxu0 %v3112_v4  ;;  %734 = vmatprep.mubr.bf16.mxu0 %v3018_v2 }
 0x270   :  { %704 = vmatprep.subr.bf16.mxu0 %v3122_v6 }
 0x273   :  { %705 = vmatpush1.bf16.msra.mxu0 %v3130_v8 }
 0x274   :  { %706 = vmatprep.subr.bf16.mxu0 %v3139_v10 }
 0x277   :  { %707 = vmatpush1.bf16.msra.mxu0 %v3147_v12 }
 0x278   :  { %708 = vmatprep.subr.bf16.mxu0 %v3157_v14 }
 0x27b   :  { %709 = vmatpush1.bf16.msra.mxu0 %v3165_v16 }
 0x27c   :  { %1018 = vmatprep.subr.bf16.mxu0 %v3102_v1 }
 0x341   :  { %v423_v53 = vpop.f32.mrb[4].mxu0 }
 0x342   :  { %v425_v54 = vpop.f32.mrb[5].mxu0  ;;  %v440_v9 = vadd.f32 %v423_v53, %v3220_v43  ;;  %v432_v11 = vrot.slane %v423_v53, 7 }
 0x343   :  { %v433_v55 = vrot.slane %v425_v54, 7  ;;  %v441_v56 = vadd.f32 %v425_v54, %v3208_v34  ;;  %v427_v57 = vpop.f32.mrb[6].mxu0 }
 0x344   :  { %v428_v58 = vpop.f32.mrb[7].mxu0  ;;  %v2547_v13 = vmul.f32 -1.442695, %v440_v9  ;;  %v438_v15 = vadd.f32 %v432_v11, %v3222_v44 }
 0x345   :  { %2795 = vtanh.f32 %v441_v56  ;;  %v439_v59 = vadd.f32 %v433_v55, %v3210_v35  ;;  %v2548_v52 = vmul.f32 -1.442695, %v441_v56 }
 0x346   :  { %v2545_v17 = vmul.f32 -1.442695, %v438_v15  ;;  %v526_v15 = vrot.slane %v3266_v47, 7 }
 0x347   :  { %2797 = vtanh.f32 %v439_v59  ;;  %v2546_v53 = vmul.f32 -1.442695, %v439_v59 }
 0x348   :  { %2799 = vpow2.f32 %v2547_v13 }
 0x349   :  { %2801 = vpow2.f32 %v2545_v17 }
 0x34f   :  { %v2796_v61 = vpop.eup %2795 }
 0x350   :  { %484 = vrot.lane.b32.xlu1 %v2796_v61, %s3019_s4 }
 0x351   :  { %v2798_v3 = vpop.eup %2797 }
 0x352   :  { %482 = vrot.lane.b32.xlu0 %v2798_v3, %s3019_s4  ;;  %v2800_v18 = vpop.eup %2799  ;;  %v1479_v3 = vrot.slane %v3256_v37, %v3217_v40 }
 0x353   :  { %v456_v19 = vadd.f32 1.0, %v2800_v18  ;;  %v2802_v23 = vpop.eup %2801  ;;  %v1475_v18 = vrot.slane %v3266_v47, %v3217_v40 }
 0x354   :  { %474 = vrot.lane.b32.xlu1 %v471_v0, %s3019_s4  ;;  %v454_v24 = vadd.f32 1.0, %v2802_v23  ;;  %v1481_v37 = vsel %vm1469_vm5, %v1479_v3, 0.0  ;;  %v1488_v13 = vsel %vm1484_vm6, %v1479_v3, 0.0 }
 0x355   :  { %2803 = vrcp.f32 %v456_v19 }
 0x356   :  { %472 = vrot.lane.b32.xlu0 %v470_v7, %s3019_s4  ;;  %2805 = vrcp.f32 %v454_v24 }
 0x35f   :  { %v2804_v25 = vpop.eup %2803 }
 0x360   :  { %v2806_v32 = vpop.eup %2805 }
 0x3c2   :  { %v485_v26 = vpop.permute.xlu1 %484 }
 0x3c3   :  { %v489_v27 = vmul.f32 %v2804_v25, %v485_v26 }
 0x3c4   :  { %v483_v33 = vpop.permute.xlu0 %482 }
 0x3c5   :  { %494 = vrot.lane.b32.xlu1 %v489_v27, %s3019_s4  ;;  %v488_v36 = vmul.f32 %v2806_v32, %v483_v33 }
 0x3c6   :  { %v475_v20 = vpop.permute.xlu1 %474 }
 0x3c7   :  { %492 = vrot.lane.b32.xlu0 %v488_v36, %s3019_s4  ;;  %v479_v38 = vmul.f32 %v2804_v25, %v475_v20  ;;  %v1480_v36 = vsel %vm1469_vm5, %v1475_v18, 0.0  ;;  %v1487_v20 = vsel %vm1484_vm6, %v1475_v18, 0.0 }
 0x3c8   :  { %v473_v41 = vpop.permute.xlu0 %472 }
 0x3c9   :  { %v478_v46 = vmul.f32 %v2806_v32, %v473_v41 }
 0x437   :  { %v495_v39 = vpop.permute.xlu1 %494 }
 0x438   :  { %v499_v45 = vadd.f32 %v495_v39, %v479_v38 }
 0x439   :  { %v493_v48 = vpop.permute.xlu0 %492 }
 0x43a   :  { %2807 = vtanh.f32 %v499_v45  ;;  %v498_v49 = vadd.f32 %v493_v48, %v478_v46 }
 0x43c   :  { %2809 = vtanh.f32 %v498_v49 }
 0x43d   :  { %2811 = vpow2.f32 %v2548_v52 }
 0x43e   :  { %2813 = vpow2.f32 %v2546_v53 }
 0x444   :  { %v2808_v50 = vpop.eup %2807 }
 0x445   :  { %506 = vrot.lane.b32.xlu1 %v2808_v50, %s3019_s4 }
 0x446   :  { %v2810_v51 = vpop.eup %2809 }
 0x447   :  { %504 = vrot.lane.b32.xlu0 %v2810_v51, %s3019_s4  ;;  %v2812_v54 = vpop.eup %2811 }
 0x448   :  { %v457_v55 = vadd.f32 1.0, %v2812_v54  ;;  %v2814_v57 = vpop.eup %2813 }
 0x449   :  { %516 = vrot.lane.b32.xlu1 %v499_v45, %s3019_s4  ;;  %v455_v58 = vadd.f32 1.0, %v2814_v57 }
 0x44a   :  { %2815 = vrcp.f32 %v457_v55 }
 0x44b   :  { %514 = vrot.lane.b32.xlu0 %v498_v49, %s3019_s4  ;;  %2817 = vrcp.f32 %v455_v58 }
 0x454   :  { %v2816_v60 = vpop.eup %2815 }
 0x455   :  { %v2818_v11 = vpop.eup %2817 }
 0x4b7   :  { %v507_v61 = vpop.permute.xlu1 %506 }
 0x4b8   :  { %v511_v9 = vmul.f32 %v2816_v60, %v507_v61 }
 0x4b9   :  { %v505_v17 = vpop.permute.xlu0 %504 }
 0x4ba   :  { %v3318_v56 = vsel %vm363_vm2, %v511_v9, %v527_v63  ;;  %v510_v24 = vmul.f32 %v2818_v11, %v505_v17 }
 0x4bb   :  { %v1501_v59 = vrot.slane %v3318_v56, %v3202_v22  ;;  %v533_v32 = vpack.c.bf16 %v3318_v56, %v3318_v56 }
 0x4bc   :  { %v3339_v27 = vsel %vm362_vm3, %v510_v24, %v526_v15 }
 0x4bd   :  { %v1503_v19 = vsel %vm1491_vm7, %v1501_v59, 0.0  ;;  %v1510_v23 = vsel %vm1506_vm8, %v1501_v59, 0.0  ;;  %v532_v47 = vpack.c.bf16 %v3339_v27, %v3339_v27  ;;  %v1497_v33 = vrot.slane %v3339_v27, %v3202_v22  ;;  %v515_v63 = vpop.permute.xlu0 %514  ;;  %v517_v59 = vpop.permute.xlu1 %516 }
 0x4be   :  { %v3333_v25 = vadd.f32 %v1503_v19, %v1481_v37  ;;  %v3335_v26 = vadd.f32 %v1510_v23, %v1488_v13  ;;  %v537_v48 = vunpack.c.l.b16 %v533_v32  ;;  %v3376_v9 = vsel %vm362_vm3, %v515_v63, %v470_v7 }
 0x4bf   :  { %v536_v38 = vunpack.c.l.b16 %v532_v47  ;;  %v1502_v39 = vsel %vm1491_vm7, %v1497_v33, 0.0  ;;  %v1509_v41 = vsel %vm1506_vm8, %v1497_v33, 0.0  ;;  %v627_v11 = vrot.slane %v3376_v9, 7 }
 0x4c0   :  { %v3355_v45 = vadd.f32 %v1502_v39, %v1480_v36  ;;  %v3357_v46 = vadd.f32 %v1509_v41, %v1487_v20  ;;  %v3384_v13 = vsel %vm363_vm2, %v517_v59, %v471_v0 }
 0x4c1   :  { %v538_v49 = vrot.slane %v536_v38, 1  ;;  %v628_v5 = vrot.slane %v3384_v13, 7 }
 0x4c3   :  { %v539_v50 = vsel %vm383_vm4, %v537_v48, %v538_v49 }
 0x4c4   :  { %v540_v51 = vpack.c.b16 %v539_v50, %v539_v50 }
 0x4c6   :  { %2549 = vmatmul.mubr.msk.bf16.vlgmr.msra.gmra.mrb[4].mxu1 %vm116_vm0, %v540_v51 }
 0x4c7   :  { %861 = vmatpush1.bf16.msra.mxu1 %v3112_v4  ;;  %892 = vmatprep.mubr.bf16.mxu1 %v3018_v2 }
 0x4c8   :  { %862 = vmatprep.subr.bf16.mxu1 %v3122_v6 }
 0x4cb   :  { %863 = vmatpush1.bf16.msra.mxu1 %v3130_v8 }
 0x4cc   :  { %864 = vmatprep.subr.bf16.mxu1 %v3139_v10 }
 0x4cf   :  { %865 = vmatpush1.bf16.msra.mxu1 %v3147_v12 }
 0x4d0   :  { %866 = vmatprep.subr.bf16.mxu1 %v3157_v14 }
 0x4d3   :  { %867 = vmatpush1.bf16.msra.mxu1 %v3165_v16 }
 0x4d4   :  { %1176 = vmatprep.subr.bf16.mxu1 %v3102_v1 }
 0x599   :  { %v578_v52 = vpop.f32.mrb[4].mxu1 }
 0x59a   :  { %v580_v53 = vpop.f32.mrb[5].mxu1  ;;  %v587_v7 = vrot.slane %v578_v52, 6  ;;  %v589_v62 = vrot.slane %v578_v52, 7 }
 0x59b   :  { %v588_v54 = vrot.slane %v580_v53, 6  ;;  %v582_v55 = vpop.f32.mrb[6].mxu1  ;;  %v590_v57 = vrot.slane %v580_v53, 7 }
 0x59c   :  { %v583_v58 = vpop.f32.mrb[7].mxu1  ;;  %v595_v15 = vadd.f32 %v587_v7, %v3222_v44  ;;  %v597_v0 = vadd.f32 %v589_v62, %v3220_v43  ;;  %v1518_v62 = vsub.s32 2, %v3199_v21 }
 0x59d   :  { %v596_v60 = vadd.f32 %v588_v54, %v3210_v35  ;;  %v598_v61 = vadd.f32 %v590_v57, %v3208_v34 }
 0x59e   :  { %v2550_v17 = vmul.f32 -1.442695, %v595_v15  ;;  %v2552_v18 = vmul.f32 -1.442695, %v597_v0  ;;  %v683_v0 = vrot.slane %v3339_v27, 7 }
 0x59f   :  { %2819 = vtanh.f32 %v596_v60  ;;  %v2551_v58 = vmul.f32 -1.442695, %v596_v60  ;;  %v2553_v63 = vmul.f32 -1.442695, %v598_v61 }
 0x5a0   :  { %2821 = vtanh.f32 %v598_v61 }
 0x5a1   :  { %2823 = vpow2.f32 %v2550_v17 }
 0x5a2   :  { %2825 = vpow2.f32 %v2552_v18 }
 0x5a9   :  { %v2820_v3 = vpop.eup %2819 }
 0x5aa   :  { %639 = vrot.lane.b32.xlu0 %v2820_v3, %s3019_s4  ;;  %v2822_v37 = vpop.eup %2821 }
 0x5ab   :  { %641 = vrot.lane.b32.xlu1 %v2822_v37, %s3019_s4  ;;  %v2824_v19 = vpop.eup %2823 }
 0x5ac   :  { %v611_v23 = vadd.f32 1.0, %v2824_v19  ;;  %v2826_v24 = vpop.eup %2825 }
 0x5ad   :  { %v613_v32 = vadd.f32 1.0, %v2826_v24 }
 0x5ae   :  { %629 = vrot.lane.b32.xlu0 %v627_v11, %s3019_s4  ;;  %2827 = vrcp.f32 %v611_v23 }
 0x5af   :  { %631 = vrot.lane.b32.xlu1 %v628_v5, %s3019_s4  ;;  %2829 = vrcp.f32 %v613_v32  ;;  %v684_v32 = vrot.slane %v3318_v56, 7 }
 0x5b8   :  { %v2828_v47 = vpop.eup %2827 }
 0x5b9   :  { %v2830_v20 = vpop.eup %2829 }
 0x61c   :  { %v640_v33 = vpop.permute.xlu0 %639 }
 0x61d   :  { %v645_v36 = vmul.f32 %v2828_v47, %v640_v33  ;;  %v642_v38 = vpop.permute.xlu1 %641 }
 0x61e   :  { %v646_v39 = vmul.f32 %v2830_v20, %v642_v38 }
 0x61f   :  { %649 = vrot.lane.b32.xlu0 %v645_v36, %s3019_s4 }
 0x620   :  { %651 = vrot.lane.b32.xlu1 %v646_v39, %s3019_s4  ;;  %v630_v41 = vpop.permute.xlu0 %629 }
 0x621   :  { %v635_v48 = vmul.f32 %v2828_v47, %v630_v41  ;;  %v632_v50 = vpop.permute.xlu1 %631 }
 0x622   :  { %v636_v52 = vmul.f32 %v2830_v20, %v632_v50 }
 0x691   :  { %v650_v49 = vpop.permute.xlu0 %649 }
 0x692   :  { %v655_v51 = vadd.f32 %v650_v49, %v635_v48  ;;  %v652_v53 = vpop.permute.xlu1 %651 }
 0x693   :  { %v656_v54 = vadd.f32 %v652_v53, %v636_v52 }
 0x694   :  { %2831 = vtanh.f32 %v655_v51 }
 0x695   :  { %2833 = vtanh.f32 %v656_v54 }
 0x696   :  { %2835 = vpow2.f32 %v2551_v58 }
 0x697   :  { %2837 = vpow2.f32 %v2553_v63 }
 0x69e   :  { %v2832_v55 = vpop.eup %2831 }
 0x69f   :  { %661 = vrot.lane.b32.xlu0 %v2832_v55, %s3019_s4  ;;  %v2834_v57 = vpop.eup %2833 }
 0x6a0   :  { %663 = vrot.lane.b32.xlu1 %v2834_v57, %s3019_s4  ;;  %v2836_v3 = vpop.eup %2835 }
 0x6a1   :  { %v612_v59 = vadd.f32 1.0, %v2836_v3  ;;  %v2838_v37 = vpop.eup %2837 }
 0x6a2   :  { %v614_v7 = vadd.f32 1.0, %v2838_v37 }
 0x6a3   :  { %671 = vrot.lane.b32.xlu0 %v655_v51, %s3019_s4  ;;  %2839 = vrcp.f32 %v612_v59 }
 0x6a4   :  { %673 = vrot.lane.b32.xlu1 %v656_v54, %s3019_s4  ;;  %2841 = vrcp.f32 %v614_v7 }
 0x6ad   :  { %v2840_v15 = vpop.eup %2839 }
 0x6ae   :  { %v2842_v23 = vpop.eup %2841 }
 0x711   :  { %v662_v17 = vpop.permute.xlu0 %661 }
 0x712   :  { %v667_v18 = vmul.f32 %v2840_v15, %v662_v17  ;;  %v664_v24 = vpop.permute.xlu1 %663 }
 0x713   :  { %v668_v33 = vmul.f32 %v2842_v23, %v664_v24 }
 0x714   :  { %v3408_v60 = vsel %vm362_vm3, %v667_v18, %v683_v0 }
 0x715   :  { %v689_v61 = vpack.c.bf16 %v3408_v60, %v3408_v60  ;;  %v1519_v19 = vrot.slane %v3408_v60, %v1518_v62  ;;  %v3426_v39 = vsel %vm363_vm2, %v668_v33, %v684_v32 }
 0x716   :  { %v690_v56 = vpack.c.bf16 %v3426_v39, %v3426_v39  ;;  %v1523_v41 = vrot.slane %v3426_v39, %v1518_v62 }
 0x717   :  { %v1524_v27 = vsel %vm1513_vm9, %v1519_v19, 0.0  ;;  %v1531_v47 = vsel %vm1528_vm10, %v1519_v19, 0.0  ;;  %v693_v36 = vunpack.c.l.b16 %v689_v61 }
 0x718   :  { %v3419_v20 = vadd.f32 %v1524_v27, %v3355_v45  ;;  %v3422_v38 = vadd.f32 %v1531_v47, %v3357_v46  ;;  %v694_v49 = vunpack.c.l.b16 %v690_v56  ;;  %v1525_v50 = vsel %vm1513_vm9, %v1523_v41, 0.0 }
 0x719   :  { %v695_v48 = vrot.slane %v693_v36, 2  ;;  %v1532_v45 = vsel %vm1528_vm10, %v1523_v41, 0.0  ;;  %v3436_v46 = vadd.f32 %v1525_v50, %v3333_v25 }
 0x71a   :  { %v3439_v51 = vadd.f32 %v1532_v45, %v3335_v26  ;;  %v696_v52 = vrot.slane %v694_v49, 1 }
 0x71c   :  { %v697_v53 = vsel %vm383_vm4, %v696_v52, %v695_v48 }
 0x71d   :  { %v698_v54 = vpack.c.b16 %v697_v53, %v697_v53 }
 0x71f   :  { %2554 = vmatmul.mubr.msk.bf16.vlgmr.msra.gmra.mrb[8].mxu0 %vm116_vm0, %v698_v54 }
 0x720   :  { %1019 = vmatpush1.bf16.msra.mxu0 %v3112_v4  ;;  %1050 = vmatprep.mubr.bf16.mxu0 %v3018_v2 }
 0x721   :  { %1020 = vmatprep.subr.bf16.mxu0 %v3122_v6 }
 0x724   :  { %1021 = vmatpush1.bf16.msra.mxu0 %v3130_v8 }
 0x725   :  { %1022 = vmatprep.subr.bf16.mxu0 %v3139_v10  ;;  %v672_v10 = vpop.permute.xlu0 %671 }
 0x728   :  { %1023 = vmatpush1.bf16.msra.mxu0 %v3147_v12 }
 0x729   :  { %1024 = vmatprep.subr.bf16.mxu0 %v3157_v14  ;;  %v3458_v14 = vsel %vm362_vm3, %v672_v10, %v627_v11  ;;  %v841_v10 = vrot.slane %v3408_v60, 7 }
 0x72c   :  { %1025 = vmatpush1.bf16.msra.mxu0 %v3165_v16  ;;  %v785_v16 = vrot.slane %v3458_v14, 7 }
 0x72d   :  { %1334 = vmatprep.subr.bf16.mxu0 %v3102_v1  ;;  %v674_v1 = vpop.permute.xlu1 %673 }
 0x72e   :  { %v3466_v3 = vsel %vm363_vm2, %v674_v1, %v628_v5 }
 0x72f   :  { %v786_v9 = vrot.slane %v3466_v3, 7 }
 0x7f2   :  { %v736_v25 = vpop.f32.mrb[8].mxu0 }
 0x7f3   :  { %v738_v26 = vpop.f32.mrb[9].mxu0  ;;  %v745_v11 = vrot.slane %v736_v25, 5  ;;  %v747_v13 = vrot.slane %v736_v25, 6 }
 0x7f4   :  { %v746_v55 = vrot.slane %v738_v26, 5  ;;  %v740_v4 = vpop.f32.mrb[10].mxu0  ;;  %v748_v57 = vrot.slane %v738_v26, 6 }
 0x7f5   :  { %v741_v58 = vpop.f32.mrb[11].mxu0  ;;  %v753_v59 = vadd.f32 %v745_v11, %v3222_v44  ;;  %v755_v5 = vadd.f32 %v747_v13, %v3220_v43 }
 0x7f6   :  { %v754_v6 = vadd.f32 %v746_v55, %v3210_v35  ;;  %v756_v8 = vadd.f32 %v748_v57, %v3208_v34  ;;  %v1540_v57 = vsub.s32 3, %v3199_v21 }
 0x7f7   :  { %v2555_v37 = vmul.f32 -1.442695, %v753_v59  ;;  %v2557_v7 = vmul.f32 -1.442695, %v755_v5  ;;  %v842_v59 = vrot.slane %v3426_v39, 7 }
 0x7f8   :  { %2843 = vtanh.f32 %v754_v6  ;;  %v2556_v52 = vmul.f32 -1.442695, %v754_v6  ;;  %v2558_v53 = vmul.f32 -1.442695, %v756_v8 }
 0x7f9   :  { %2845 = vtanh.f32 %v756_v8 }
 0x7fa   :  { %2847 = vpow2.f32 %v2555_v37 }
 0x7fb   :  { %2849 = vpow2.f32 %v2557_v7 }
 0x802   :  { %v2844_v12 = vpop.eup %2843 }
 0x803   :  { %797 = vrot.lane.b32.xlu0 %v2844_v12, %s3019_s4  ;;  %v2846_v63 = vpop.eup %2845 }
 0x804   :  { %799 = vrot.lane.b32.xlu1 %v2846_v63, %s3019_s4  ;;  %v2848_v15 = vpop.eup %2847 }
 0x805   :  { %v769_v62 = vadd.f32 1.0, %v2848_v15  ;;  %v2850_v17 = vpop.eup %2849 }
 0x806   :  { %v771_v0 = vadd.f32 1.0, %v2850_v17 }
 0x807   :  { %787 = vrot.lane.b32.xlu0 %v785_v16, %s3019_s4  ;;  %2851 = vrcp.f32 %v769_v62 }
 0x808   :  { %789 = vrot.lane.b32.xlu1 %v786_v9, %s3019_s4  ;;  %2853 = vrcp.f32 %v771_v0 }
 0x811   :  { %v2852_v18 = vpop.eup %2851 }
 0x812   :  { %v2854_v23 = vpop.eup %2853 }
 0x875   :  { %v798_v61 = vpop.permute.xlu0 %797 }
 0x876   :  { %v803_v19 = vmul.f32 %v2852_v18, %v798_v61  ;;  %v800_v24 = vpop.permute.xlu1 %799 }
 0x877   :  { %v804_v32 = vmul.f32 %v2854_v23, %v800_v24 }
 0x878   :  { %807 = vrot.lane.b32.xlu0 %v803_v19, %s3019_s4 }
 0x879   :  { %809 = vrot.lane.b32.xlu1 %v804_v32, %s3019_s4  ;;  %v788_v27 = vpop.permute.xlu0 %787 }
 0x87a   :  { %v793_v47 = vmul.f32 %v2852_v18, %v788_v27  ;;  %v790_v36 = vpop.permute.xlu1 %789  ;;  %v3528_v27 = vld [vmem:[%s4032_s3] ss:$8 sps:$4 sm:$0xff]  }
 0x87b   :  { %v794_v41 = vmul.f32 %v2854_v23, %v790_v36  ;;  %v3559_v36 = vld [vmem:[%s4032_s3 + $0x34] ss:$8 sps:$4 sm:$0xff]  }
 0x8ea   :  { %v808_v33 = vpop.permute.xlu0 %807 }
 0x8eb   :  { %v813_v56 = vadd.f32 %v808_v33, %v793_v47  ;;  %v810_v48 = vpop.permute.xlu1 %809  ;;  %v3547_v47 = vld [vmem:[%s4032_s3 + $0x24] ss:$8 sps:$4 sm:$0xff]   ;;  %v3553_v33 = vld [vmem:[%s4032_s3 + $0x20] ss:$8 sps:$4 sm:$0xff]  }
 0x8ec   :  { %v814_v49 = vadd.f32 %v810_v48, %v794_v41 }
 0x8ed   :  { %2855 = vtanh.f32 %v813_v56 }
 0x8ee   :  { %2857 = vtanh.f32 %v814_v49 }
 0x8ef   :  { %2859 = vpow2.f32 %v2556_v52 }
 0x8f0   :  { %2861 = vpow2.f32 %v2558_v53 }
 0x8f7   :  { %v2856_v50 = vpop.eup %2855 }
 0x8f8   :  { %819 = vrot.lane.b32.xlu0 %v2856_v50, %s3019_s4  ;;  %v2858_v45 = vpop.eup %2857 }
 0x8f9   :  { %821 = vrot.lane.b32.xlu1 %v2858_v45, %s3019_s4  ;;  %v2860_v54 = vpop.eup %2859 }
 0x8fa   :  { %v770_v25 = vadd.f32 1.0, %v2860_v54  ;;  %v2862_v26 = vpop.eup %2861 }
 0x8fb   :  { %v772_v55 = vadd.f32 1.0, %v2862_v26 }
 0x8fc   :  { %829 = vrot.lane.b32.xlu0 %v813_v56, %s3019_s4  ;;  %2863 = vrcp.f32 %v770_v25  ;;  %v3565_v56 = vld [vmem:[%s4032_s3 + $0x30] ss:$8 sps:$4 sm:$0xff]  }
 0x8fd   :  { %831 = vrot.lane.b32.xlu1 %v814_v49, %s3019_s4  ;;  %2865 = vrcp.f32 %v772_v55 }
 0x906   :  { %v2864_v4 = vpop.eup %2863 }
 0x907   :  { %v2866_v63 = vpop.eup %2865 }
 0x96a   :  { %v820_v58 = vpop.permute.xlu0 %819 }
 0x96b   :  { %v825_v12 = vmul.f32 %v2864_v4, %v820_v58  ;;  %v822_v11 = vpop.permute.xlu1 %821 }
 0x96c   :  { %v826_v37 = vmul.f32 %v2866_v63, %v822_v11 }
 0x96d   :  { %v3490_v6 = vsel %vm362_vm3, %v825_v12, %v841_v10 }
 0x96e   :  { %v847_v8 = vpack.c.bf16 %v3490_v6, %v3490_v6  ;;  %v1541_v1 = vrot.slane %v3490_v6, %v1540_v57  ;;  %v3508_v62 = vsel %vm363_vm2, %v826_v37, %v842_v59  ;;  %v830_v25 = vpop.permute.xlu0 %829 }
 0x96f   :  { %v848_v39 = vpack.c.bf16 %v3508_v62, %v3508_v62  ;;  %v1545_v17 = vrot.slane %v3508_v62, %v1540_v57  ;;  %v3574_v55 = vsel %vm362_vm3, %v830_v25, %v785_v16  ;;  %v832_v4 = vpop.permute.xlu1 %831 }
 0x970   :  { %v1546_v60 = vsel %vm1535_vm11, %v1541_v1, 0.0  ;;  %v1553_v13 = vsel %vm1550_vm12, %v1541_v1, 0.0  ;;  %v851_v5 = vunpack.c.l.b16 %v847_v8  ;;  %v943_v57 = vrot.slane %v3574_v55, 7 }
 0x971   :  { %v3501_v7 = vadd.f32 %v1546_v60, %v3419_v20  ;;  %v3504_v15 = vadd.f32 %v1553_v13, %v3422_v38  ;;  %v852_v18 = vunpack.c.l.b16 %v848_v39  ;;  %v1547_v61 = vsel %vm1535_vm11, %v1545_v17, 0.0 }
 0x972   :  { %v853_v0 = vrot.slane %v851_v5, 3  ;;  %v1554_v20 = vsel %vm1550_vm12, %v1545_v17, 0.0  ;;  %v3518_v38 = vadd.f32 %v1547_v61, %v3436_v46  ;;  %v3535_v46 = vld [vmem:[%s4032_s3 + $0x14] ss:$8 sps:$4 sm:$0xff]   ;;  %v3582_v10 = vsel %vm363_vm2, %v832_v4, %v786_v9 }
 0x973   :  { %v3521_v19 = vadd.f32 %v1554_v20, %v3439_v51  ;;  %v854_v23 = vrot.slane %v852_v18, 2  ;;  %v3541_v51 = vld [vmem:[%s4032_s3 + $0x10] ss:$8 sps:$4 sm:$0xff]   ;;  %v944_v14 = vrot.slane %v3582_v10, 7 }
 0x975   :  { %v855_v24 = vsel %vm383_vm4, %v854_v23, %v853_v0 }
 0x976   :  { %v856_v32 = vpack.c.b16 %v855_v24, %v855_v24 }
 0x978   :  { %2559 = vmatmul.mubr.msk.bf16.vlgmr.msra.gmra.mrb[8].mxu1 %vm116_vm0, %v856_v32 }
 0x979   :  { %1177 = vmatpush1.bf16.msra.mxu1 %v3528_v27  ;;  %1208 = vmatprep.mubr.bf16.mxu1 %v3018_v2 }
 0x97a   :  { %1178 = vmatprep.subr.bf16.mxu1 %v3535_v46 }
 0x97d   :  { %1179 = vmatpush1.bf16.msra.mxu1 %v3541_v51 }
 0x97e   :  { %1180 = vmatprep.subr.bf16.mxu1 %v3547_v47 }
 0x981   :  { %1181 = vmatpush1.bf16.msra.mxu1 %v3553_v33 }
 0x982   :  { %1182 = vmatprep.subr.bf16.mxu1 %v3559_v36 }
 0x985   :  { %1183 = vmatpush1.bf16.msra.mxu1 %v3565_v56 }
 0xa4b   :  { %v894_v41 = vpop.f32.mrb[8].mxu1 }
 0xa4c   :  { %v896_v48 = vpop.f32.mrb[9].mxu1  ;;  %v903_v16 = vrot.slane %v894_v41, 4  ;;  %v905_v3 = vrot.slane %v894_v41, 5 }
 0xa4d   :  { %v904_v49 = vrot.slane %v896_v48, 4  ;;  %v898_v50 = vpop.f32.mrb[10].mxu1  ;;  %v906_v45 = vrot.slane %v896_v48, 5 }
 0xa4e   :  { %v899_v52 = vpop.f32.mrb[11].mxu1  ;;  %v911_v12 = vadd.f32 %v903_v16, %v3222_v44  ;;  %v913_v9 = vadd.f32 %v905_v3, %v3220_v43 }
 0xa4f   :  { %v912_v53 = vadd.f32 %v904_v49, %v3210_v35  ;;  %v914_v54 = vadd.f32 %v906_v45, %v3208_v34 }
 0xa50   :  { %v2560_v8 = vmul.f32 -1.442695, %v911_v12  ;;  %v2562_v1 = vmul.f32 -1.442695, %v913_v9  ;;  %v1559_v12 = vsub.s32 4, %v3199_v21 }
 0xa51   :  { %2867 = vtanh.f32 %v912_v53  ;;  %v2561_v45 = vmul.f32 -1.442695, %v912_v53  ;;  %v2563_v52 = vmul.f32 -1.442695, %v914_v54 }
 0xa52   :  { %2869 = vtanh.f32 %v914_v54 }
 0xa53   :  { %2871 = vpow2.f32 %v2560_v8  ;;  %v999_v8 = vrot.slane %v3490_v6, 7 }
 0xa54   :  { %2873 = vpow2.f32 %v2562_v1 }
 0xa5b   :  { %v2868_v26 = vpop.eup %2867 }
 0xa5c   :  { %955 = vrot.lane.b32.xlu0 %v2868_v26, %s3019_s4  ;;  %v2870_v58 = vpop.eup %2869 }
 0xa5d   :  { %957 = vrot.lane.b32.xlu1 %v2870_v58, %s3019_s4  ;;  %v2872_v63 = vpop.eup %2871 }
 0xa5e   :  { %v927_v11 = vadd.f32 1.0, %v2872_v63  ;;  %v2874_v59 = vpop.eup %2873 }
 0xa5f   :  { %v929_v60 = vadd.f32 1.0, %v2874_v59  ;;  %v1000_v59 = vrot.slane %v3508_v62, 7 }
 0xa60   :  { %945 = vrot.lane.b32.xlu0 %v943_v57, %s3019_s4  ;;  %2875 = vrcp.f32 %v927_v11 }
 0xa61   :  { %947 = vrot.lane.b32.xlu1 %v944_v14, %s3019_s4  ;;  %2877 = vrcp.f32 %v929_v60 }
 0xa6a   :  { %v2876_v13 = vpop.eup %2875 }
 0xa6b   :  { %v2878_v39 = vpop.eup %2877 }
 0xace   :  { %v956_v37 = vpop.permute.xlu0 %955 }
 0xacf   :  { %v961_v5 = vmul.f32 %v2876_v13, %v956_v37  ;;  %v958_v17 = vpop.permute.xlu1 %957 }
 0xad0   :  { %v962_v0 = vmul.f32 %v2878_v39, %v958_v17 }
 0xad1   :  { %965 = vrot.lane.b32.xlu0 %v961_v5, %s3019_s4 }
 0xad2   :  { %967 = vrot.lane.b32.xlu1 %v962_v0, %s3019_s4  ;;  %v946_v18 = vpop.permute.xlu0 %945 }
 0xad3   :  { %v951_v61 = vmul.f32 %v2876_v13, %v946_v18  ;;  %v948_v23 = vpop.permute.xlu1 %947 }
 0xad4   :  { %v952_v32 = vmul.f32 %v2878_v39, %v948_v23 }
 0xb43   :  { %v966_v20 = vpop.permute.xlu0 %965 }
 0xb44   :  { %v971_v24 = vadd.f32 %v966_v20, %v951_v61  ;;  %v968_v41 = vpop.permute.xlu1 %967 }
 0xb45   :  { %v972_v48 = vadd.f32 %v968_v41, %v952_v32 }
 0xb46   :  { %2879 = vtanh.f32 %v971_v24 }
 0xb47   :  { %2881 = vtanh.f32 %v972_v48 }
 0xb48   :  { %2883 = vpow2.f32 %v2561_v45 }
 0xb49   :  { %2885 = vpow2.f32 %v2563_v52 }
 0xb50   :  { %v2880_v49 = vpop.eup %2879 }
 0xb51   :  { %977 = vrot.lane.b32.xlu0 %v2880_v49, %s3019_s4  ;;  %v2882_v50 = vpop.eup %2881 }
 0xb52   :  { %979 = vrot.lane.b32.xlu1 %v2882_v50, %s3019_s4  ;;  %v2884_v25 = vpop.eup %2883 }
 0xb53   :  { %v928_v26 = vadd.f32 1.0, %v2884_v25  ;;  %v2886_v4 = vpop.eup %2885 }
 0xb54   :  { %v930_v58 = vadd.f32 1.0, %v2886_v4 }
 0xb55   :  { %987 = vrot.lane.b32.xlu0 %v971_v24, %s3019_s4  ;;  %2887 = vrcp.f32 %v928_v26 }
 0xb56   :  { %989 = vrot.lane.b32.xlu1 %v972_v48, %s3019_s4  ;;  %2889 = vrcp.f32 %v930_v58 }
 0xb5f   :  { %v2888_v16 = vpop.eup %2887 }
 0xb60   :  { %v2890_v63 = vpop.eup %2889 }
 0xbc3   :  { %v978_v3 = vpop.permute.xlu0 %977 }
 0xbc4   :  { %v983_v9 = vmul.f32 %v2888_v16, %v978_v3  ;;  %v980_v11 = vpop.permute.xlu1 %979 }
 0xbc5   :  { %v984_v13 = vmul.f32 %v2890_v63, %v980_v11 }
 0xbc6   :  { %v3604_v1 = vsel %vm362_vm3, %v983_v9, %v999_v8 }
 0xbc7   :  { %v1005_v53 = vpack.c.bf16 %v3604_v1, %v3604_v1  ;;  %v1560_v54 = vrot.slane %v3604_v1, %v1559_v12  ;;  %v3622_v17 = vsel %vm363_vm2, %v984_v13, %v1000_v59 }
 0xbc8   :  { %v1006_v62 = vpack.c.bf16 %v3622_v17, %v3622_v17  ;;  %v1564_v0 = vrot.slane %v3622_v17, %v1559_v12 }
 0xbc9   :  { %v1565_v60 = vsel %vm1550_vm12, %v1560_v54, 0.0  ;;  %v1569_v6 = vsel %vm1535_vm11, %v1560_v54, 0.0  ;;  %v1009_v37 = vunpack.c.l.b16 %v1005_v53 }
 0xbca   :  { %v3615_v5 = vadd.f32 %v1565_v60, %v3501_v7  ;;  %v3618_v39 = vadd.f32 %v1569_v6, %v3504_v15  ;;  %v1010_v61 = vunpack.c.l.b16 %v1006_v62  ;;  %v1566_v20 = vsel %vm1550_vm12, %v1564_v0, 0.0 }
 0xbcb   :  { %v1011_v18 = vrot.slane %v1009_v37, 4  ;;  %v1570_v7 = vsel %vm1535_vm11, %v1564_v0, 0.0  ;;  %v3632_v15 = vadd.f32 %v1566_v20, %v3518_v38 }
 0xbcc   :  { %v3635_v23 = vadd.f32 %v1570_v7, %v3521_v19  ;;  %v1012_v24 = vrot.slane %v1010_v61, 3 }
 0xbce   :  { %v1013_v32 = vsel %vm383_vm4, %v1012_v24, %v1011_v18 }
 0xbcf   :  { %v1014_v41 = vpack.c.b16 %v1013_v32, %v1013_v32 }
 0xbd1   :  { %2564 = vmatmul.mubr.msk.bf16.vlgmr.msra.gmra.mrb[12].mxu0 %vm116_vm0, %v1014_v41 }
 0xbd2   :  { %1335 = vmatpush1.bf16.msra.mxu0 %v3528_v27  ;;  %1366 = vmatprep.mubr.bf16.mxu0 %v3018_v2 }
 0xbd3   :  { %1336 = vmatprep.subr.bf16.mxu0 %v3535_v46 }
 0xbd6   :  { %1337 = vmatpush1.bf16.msra.mxu0 %v3541_v51  ;;  %v988_v51 = vpop.permute.xlu0 %987 }
 0xbd7   :  { %1338 = vmatprep.subr.bf16.mxu0 %v3547_v47 }
 0xbda   :  { %1339 = vmatpush1.bf16.msra.mxu0 %v3553_v33  ;;  %v3653_v33 = vsel %vm362_vm3, %v988_v51, %v943_v57  ;;  %v1157_v51 = vrot.slane %v3604_v1, 7 }
 0xbdb   :  { %1340 = vmatprep.subr.bf16.mxu0 %v3559_v36  ;;  %v990_v36 = vpop.permute.xlu1 %989 }
 0xbdc   :  { %v3661_v25 = vsel %vm363_vm2, %v990_v36, %v944_v14 }
 0xbdd   :  { %v1102_v55 = vrot.slane %v3661_v25, 7 }
 0xbde   :  { %1341 = vmatpush1.bf16.msra.mxu0 %v3565_v56  ;;  %v1101_v56 = vrot.slane %v3653_v33, 7 }
 0xca4   :  { %v1052_v38 = vpop.f32.mrb[12].mxu0 }
 0xca5   :  { %v1054_v19 = vpop.f32.mrb[13].mxu0  ;;  %v1061_v57 = vrot.slane %v1052_v38, 3  ;;  %v1063_v10 = vrot.slane %v1052_v38, 4 }
 0xca6   :  { %v1062_v48 = vrot.slane %v1054_v19, 3  ;;  %v1056_v49 = vpop.f32.mrb[14].mxu0  ;;  %v1064_v50 = vrot.slane %v1054_v19, 4 }
 0xca7   :  { %v1057_v27 = vpop.f32.mrb[15].mxu0  ;;  %v1069_v26 = vadd.f32 %v1061_v57, %v3222_v44  ;;  %v1071_v14 = vadd.f32 %v1063_v10, %v3220_v43 }
 0xca8   :  { %v1070_v45 = vadd.f32 %v1062_v48, %v3210_v35  ;;  %v1072_v46 = vadd.f32 %v1064_v50, %v3208_v34  ;;  %v1575_v50 = vsub.s32 5, %v3199_v21 }
 0xca9   :  { %v2565_v4 = vmul.f32 -1.442695, %v1069_v26  ;;  %v2567_v58 = vmul.f32 -1.442695, %v1071_v14  ;;  %v1158_v26 = vrot.slane %v3622_v17, 7 }
 0xcaa   :  { %2891 = vtanh.f32 %v1070_v45  ;;  %v2566_v24 = vmul.f32 -1.442695, %v1070_v45  ;;  %v2568_v32 = vmul.f32 -1.442695, %v1072_v46 }
 0xcab   :  { %2893 = vtanh.f32 %v1072_v46 }
 0xcac   :  { %2895 = vpow2.f32 %v2565_v4 }
 0xcad   :  { %2897 = vpow2.f32 %v2567_v58 }
 0xcb4   :  { %v2892_v47 = vpop.eup %2891 }
 0xcb5   :  { %1113 = vrot.lane.b32.xlu0 %v2892_v47, %s3019_s4  ;;  %v2894_v52 = vpop.eup %2893 }
 0xcb6   :  { %1115 = vrot.lane.b32.xlu1 %v2894_v52, %s3019_s4  ;;  %v2896_v16 = vpop.eup %2895 }
 0xcb7   :  { %v1085_v12 = vadd.f32 1.0, %v2896_v16  ;;  %v2898_v3 = vpop.eup %2897 }
 0xcb8   :  { %v1087_v8 = vadd.f32 1.0, %v2898_v3 }
 0xcb9   :  { %1103 = vrot.lane.b32.xlu0 %v1101_v56, %s3019_s4  ;;  %2899 = vrcp.f32 %v1085_v12 }
 0xcba   :  { %1105 = vrot.lane.b32.xlu1 %v1102_v55, %s3019_s4  ;;  %2901 = vrcp.f32 %v1087_v8 }
 0xcc3   :  { %v2900_v9 = vpop.eup %2899 }
 0xcc4   :  { %v2902_v63 = vpop.eup %2901 }
 0xd27   :  { %v1114_v53 = vpop.permute.xlu0 %1113 }
 0xd28   :  { %v1119_v54 = vmul.f32 %v2900_v9, %v1114_v53  ;;  %v1116_v11 = vpop.permute.xlu1 %1115 }
 0xd29   :  { %v1120_v59 = vmul.f32 %v2902_v63, %v1116_v11 }
 0xd2a   :  { %1123 = vrot.lane.b32.xlu0 %v1119_v54, %s3019_s4 }
 0xd2b   :  { %1125 = vrot.lane.b32.xlu1 %v1120_v59, %s3019_s4  ;;  %v1104_v60 = vpop.permute.xlu0 %1103 }
 0xd2c   :  { %v1109_v6 = vmul.f32 %v2900_v9, %v1104_v60  ;;  %v1106_v37 = vpop.permute.xlu1 %1105 }
 0xd2d   :  { %v1110_v0 = vmul.f32 %v2902_v63, %v1106_v37 }
 0xd9c   :  { %v1124_v13 = vpop.permute.xlu0 %1123 }
 0xd9d   :  { %v1129_v62 = vadd.f32 %v1124_v13, %v1109_v6  ;;  %v1126_v18 = vpop.permute.xlu1 %1125 }
 0xd9e   :  { %v1130_v61 = vadd.f32 %v1126_v18, %v1110_v0 }
 0xd9f   :  { %2903 = vtanh.f32 %v1129_v62 }
 0xda0   :  { %2905 = vtanh.f32 %v1130_v61 }
 0xda1   :  { %2907 = vpow2.f32 %v2566_v24 }
 0xda2   :  { %2909 = vpow2.f32 %v2568_v32 }
 0xda9   :  { %v2904_v20 = vpop.eup %2903 }
 0xdaa   :  { %1135 = vrot.lane.b32.xlu0 %v2904_v20, %s3019_s4  ;;  %v2906_v7 = vpop.eup %2905 }
 0xdab   :  { %1137 = vrot.lane.b32.xlu1 %v2906_v7, %s3019_s4  ;;  %v2908_v41 = vpop.eup %2907 }
 0xdac   :  { %v1086_v38 = vadd.f32 1.0, %v2908_v41  ;;  %v2910_v19 = vpop.eup %2909 }
 0xdad   :  { %v1088_v48 = vadd.f32 1.0, %v2910_v19 }
 0xdae   :  { %1145 = vrot.lane.b32.xlu0 %v1129_v62, %s3019_s4  ;;  %2911 = vrcp.f32 %v1086_v38 }
 0xdaf   :  { %1147 = vrot.lane.b32.xlu1 %v1130_v61, %s3019_s4  ;;  %2913 = vrcp.f32 %v1088_v48 }
 0xdb8   :  { %v2912_v49 = vpop.eup %2911 }
 0xdb9   :  { %v2914_v52 = vpop.eup %2913 }
 0xe1c   :  { %v1136_v27 = vpop.permute.xlu0 %1135 }
 0xe1d   :  { %v1141_v47 = vmul.f32 %v2912_v49, %v1136_v27  ;;  %v1138_v57 = vpop.permute.xlu1 %1137 }
 0xe1e   :  { %v1142_v4 = vmul.f32 %v2914_v52, %v1138_v57 }
 0xe1f   :  { %v3683_v36 = vsel %vm362_vm3, %v1141_v47, %v1157_v51 }
 0xe20   :  { %v1163_v45 = vpack.c.bf16 %v3683_v36, %v3683_v36  ;;  %v1576_v46 = vrot.slane %v3683_v36, %v1575_v50  ;;  %v3701_v12 = vsel %vm363_vm2, %v1142_v4, %v1158_v26 }
 0xe21   :  { %v1164_v17 = vpack.c.bf16 %v3701_v12, %v3701_v12  ;;  %v1580_v3 = vrot.slane %v3701_v12, %v1575_v50  ;;  %v1148_v7 = vpop.permute.xlu1 %1147 }
 0xe22   :  { %v1581_v10 = vsel %vm1528_vm10, %v1576_v46, 0.0  ;;  %v1585_v1 = vsel %vm1513_vm9, %v1576_v46, 0.0  ;;  %v1167_v14 = vunpack.c.l.b16 %v1163_v45  ;;  %v3732_v41 = vsel %vm363_vm2, %v1148_v7, %v1102_v55 }
 0xe23   :  { %v3694_v58 = vadd.f32 %v1581_v10, %v3615_v5  ;;  %v3697_v16 = vadd.f32 %v1585_v1, %v3618_v39  ;;  %v1168_v9 = vunpack.c.l.b16 %v1164_v17  ;;  %v1582_v53 = vsel %vm1528_vm10, %v1580_v3, 0.0 }
 0xe24   :  { %v1169_v8 = vrot.slane %v1167_v14, 5  ;;  %v1586_v5 = vsel %vm1513_vm9, %v1580_v3, 0.0  ;;  %v3711_v39 = vadd.f32 %v1582_v53, %v3632_v15  ;;  %v1260_v33 = vrot.slane %v3732_v41, 7 }
 0xe25   :  { %v3714_v54 = vadd.f32 %v1586_v5, %v3635_v23  ;;  %v1170_v63 = vrot.slane %v1168_v9, 4  ;;  %v1146_v23 = vpop.permute.xlu0 %1145 }
 0xe26   :  { %v3724_v20 = vsel %vm362_vm3, %v1146_v23, %v1101_v56  ;;  %v1315_v23 = vrot.slane %v3683_v36, 7 }
 0xe27   :  { %v1171_v11 = vsel %vm383_vm4, %v1170_v63, %v1169_v8  ;;  %v1259_v24 = vrot.slane %v3724_v20, 7 }
 0xe28   :  { %v1172_v59 = vpack.c.b16 %v1171_v11, %v1171_v11 }
 0xe2a   :  { %2569 = vmatmul.mubr.msk.bf16.vlgmr.msra.gmra.mrb[12].mxu1 %vm116_vm0, %v1172_v59 }
 0xefd   :  { %v1210_v60 = vpop.f32.mrb[12].mxu1 }
 0xefe   :  { %v1212_v6 = vpop.f32.mrb[13].mxu1  ;;  %v1219_v56 = vrot.slane %v1210_v60, 2  ;;  %v1221_v25 = vrot.slane %v1210_v60, 3 }
 0xeff   :  { %v1220_v13 = vrot.slane %v1212_v6, 2  ;;  %v1214_v37 = vpop.f32.mrb[14].mxu1  ;;  %v1222_v62 = vrot.slane %v1212_v6, 3 }
 0xf00   :  { %v1215_v0 = vpop.f32.mrb[15].mxu1  ;;  %v1227_v38 = vadd.f32 %v1219_v56, %v3222_v44  ;;  %v1229_v55 = vadd.f32 %v1221_v25, %v3220_v43 }
 0xf01   :  { %v1228_v18 = vadd.f32 %v1220_v13, %v3210_v35  ;;  %v1230_v15 = vadd.f32 %v1222_v62, %v3208_v34  ;;  %v1591_v62 = vsub.s32 6, %v3199_v21 }
 0xf02   :  { %v2570_v19 = vmul.f32 -1.442695, %v1227_v38  ;;  %v2572_v48 = vmul.f32 -1.442695, %v1229_v55  ;;  %v1316_v38 = vrot.slane %v3701_v12, 7 }
 0xf03   :  { %2915 = vtanh.f32 %v1228_v18  ;;  %v2571_v63 = vmul.f32 -1.442695, %v1228_v18  ;;  %v2573_v11 = vmul.f32 -1.442695, %v1230_v15 }
 0xf04   :  { %2917 = vtanh.f32 %v1230_v15 }
 0xf05   :  { %2919 = vpow2.f32 %v2570_v19 }
 0xf06   :  { %2921 = vpow2.f32 %v2572_v48 }
 0xf0d   :  { %v2916_v61 = vpop.eup %2915 }
 0xf0e   :  { %1271 = vrot.lane.b32.xlu0 %v2916_v61, %s3019_s4  ;;  %v2918_v32 = vpop.eup %2917 }
 0xf0f   :  { %1273 = vrot.lane.b32.xlu1 %v2918_v32, %s3019_s4  ;;  %v2920_v49 = vpop.eup %2919 }
 0xf10   :  { %v1243_v50 = vadd.f32 1.0, %v2920_v49  ;;  %v2922_v27 = vpop.eup %2921 }
 0xf11   :  { %v1245_v51 = vadd.f32 1.0, %v2922_v27 }
 0xf12   :  { %1261 = vrot.lane.b32.xlu0 %v1259_v24, %s3019_s4  ;;  %2923 = vrcp.f32 %v1243_v50 }
 0xf13   :  { %1263 = vrot.lane.b32.xlu1 %v1260_v33, %s3019_s4  ;;  %2925 = vrcp.f32 %v1245_v51 }
 0xf1c   :  { %v2924_v47 = vpop.eup %2923 }
 0xf1d   :  { %v2926_v52 = vpop.eup %2925 }
 0xf80   :  { %v1272_v45 = vpop.permute.xlu0 %1271 }
 0xf81   :  { %v1277_v46 = vmul.f32 %v2924_v47, %v1272_v45  ;;  %v1274_v57 = vpop.permute.xlu1 %1273 }
 0xf82   :  { %v1278_v26 = vmul.f32 %v2926_v52, %v1274_v57 }
 0xf83   :  { %1281 = vrot.lane.b32.xlu0 %v1277_v46, %s3019_s4 }
 0xf84   :  { %1283 = vrot.lane.b32.xlu1 %v1278_v26, %s3019_s4  ;;  %v1262_v10 = vpop.permute.xlu0 %1261 }
 0xf85   :  { %v1267_v1 = vmul.f32 %v2924_v47, %v1262_v10  ;;  %v1264_v14 = vpop.permute.xlu1 %1263 }
 0xf86   :  { %v1268_v3 = vmul.f32 %v2926_v52, %v1264_v14 }
 0xff5   :  { %v1282_v4 = vpop.permute.xlu0 %1281 }
 0xff6   :  { %v1287_v17 = vadd.f32 %v1282_v4, %v1267_v1  ;;  %v1284_v8 = vpop.permute.xlu1 %1283 }
 0xff7   :  { %v1288_v9 = vadd.f32 %v1284_v8, %v1268_v3 }
 0xff8   :  { %2927 = vtanh.f32 %v1287_v17 }
 0xff9   :  { %2929 = vtanh.f32 %v1288_v9 }
 0xffa   :  { %2931 = vpow2.f32 %v2571_v63 }
 0xffb   :  { %2933 = vpow2.f32 %v2573_v11 }
0x1002   :  { %v2928_v53 = vpop.eup %2927 }
0x1003   :  { %1293 = vrot.lane.b32.xlu0 %v2928_v53, %s3019_s4  ;;  %v2930_v5 = vpop.eup %2929 }
0x1004   :  { %1295 = vrot.lane.b32.xlu1 %v2930_v5, %s3019_s4  ;;  %v2932_v59 = vpop.eup %2931 }
0x1005   :  { %v1244_v60 = vadd.f32 1.0, %v2932_v59  ;;  %v2934_v6 = vpop.eup %2933 }
0x1006   :  { %v1246_v13 = vadd.f32 1.0, %v2934_v6 }
0x1007   :  { %1303 = vrot.lane.b32.xlu0 %v1287_v17, %s3019_s4  ;;  %2935 = vrcp.f32 %v1244_v60 }
0x1008   :  { %1305 = vrot.lane.b32.xlu1 %v1288_v9, %s3019_s4  ;;  %2937 = vrcp.f32 %v1246_v13 }
0x1011   :  { %v2936_v37 = vpop.eup %2935 }
0x1012   :  { %v2938_v32 = vpop.eup %2937 }
0x1075   :  { %v1294_v0 = vpop.permute.xlu0 %1293 }
0x1076   :  { %v1299_v61 = vmul.f32 %v2936_v37, %v1294_v0  ;;  %v1296_v56 = vpop.permute.xlu1 %1295 }
0x1077   :  { %v1300_v19 = vmul.f32 %v2938_v32, %v1296_v56  ;;  %v3020_v32 = vmov 0.0  }
0x1078   :  { %v3754_v7 = vsel %vm362_vm3, %v1299_v61, %v1315_v23  ;;  %2639 = vmatprep.subr.bf16.mxu1 %v3020_v32  ;;  %2651 = vmatprep.subr.bf16.mxu0 %v3020_v32 }
0x1079   :  { %v1321_v18 = vpack.c.bf16 %v3754_v7, %v3754_v7  ;;  %v1592_v15 = vrot.slane %v3754_v7, %v1591_v62  ;;  %v3772_v50 = vsel %vm363_vm2, %v1300_v19, %v1316_v38  ;;  %2647 = vmatprep.mubr.msk.bf16.mxu1 %vm3021_vm13, %v3020_v32 }
0x107a   :  { %v1322_v12 = vpack.c.bf16 %v3772_v50, %v3772_v50  ;;  %v1596_v27 = vrot.slane %v3772_v50, %v1591_v62  ;;  %v1306_v5 = vpop.permute.xlu1 %1305 }
0x107b   :  { %v1597_v25 = vsel %vm1506_vm8, %v1592_v15, 0.0  ;;  %v1601_v36 = vsel %vm1491_vm7, %v1592_v15, 0.0  ;;  %v1325_v55 = vunpack.c.l.b16 %v1321_v18 }
0x107c   :  { %v3765_v48 = vadd.f32 %v1597_v25, %v3694_v58  ;;  %v3768_v49 = vadd.f32 %v1601_v36, %v3697_v16  ;;  %v1326_v47 = vunpack.c.l.b16 %v1322_v12  ;;  %v1598_v45 = vsel %vm1506_vm8, %v1596_v27, 0.0 }
0x107d   :  { %v1327_v51 = vrot.slane %v1325_v55, 6  ;;  %v1602_v58 = vsel %vm1491_vm7, %v1596_v27, 0.0  ;;  %v3782_v16 = vadd.f32 %v1598_v45, %v3711_v39  ;;  %vm2504_vm7 = vcmask 17408  }
0x107e   :  { %v3785_v46 = vadd.f32 %v1602_v58, %v3714_v54  ;;  %v1328_v52 = vrot.slane %v1326_v47, 5  ;;  %v1304_v54 = vpop.permute.xlu0 %1303  ;;  %v2761_v47 = vld [vmem:[%s4034_s5 + $0x10] sm:$0xff]   ;;  %v2762_v58 = vld [vmem:[%s4034_s5 + $0x18] sm:$0xff]  }
0x107f   :  { %v1311_v53 = vsel %vm362_vm3, %v1304_v54, %v1259_v24 }
0x1080   :  { %v1329_v57 = vsel %vm383_vm4, %v1328_v52, %v1327_v51  ;;  %v1417_v63 = vrot.slane %v1311_v53, 7  ;;  %v2760_v51 = vld [vmem:[%s4034_s5 + $0x8] sm:$0xff]  }
0x1081   :  { %v1330_v26 = vpack.c.b16 %v1329_v57, %v1329_v57 }
0x1083   :  { %2574 = vmatmul.mubr.msk.bf16.vlgmr.msra.gmra.mrb[16].mxu0 %vm116_vm0, %v1330_v26 }
0x1084   :  { %2653 = vmatprep.mubr.msk.bf16.mxu0 %vm3021_vm13, %v3020_v32 }
0x1156   :  { %v1368_v10 = vpop.f32.mrb[16].mxu0 }
0x1157   :  { %v1370_v1 = vpop.f32.mrb[17].mxu0  ;;  %v1377_v20 = vrot.slane %v1368_v10, 1  ;;  %v1379_v59 = vrot.slane %v1368_v10, 2 }
0x1158   :  { %v1378_v4 = vrot.slane %v1370_v1, 1  ;;  %v1372_v14 = vpop.f32.mrb[18].mxu0  ;;  %v1380_v17 = vrot.slane %v1370_v1, 2 }
0x1159   :  { %v1373_v3 = vpop.f32.mrb[19].mxu0  ;;  %v1385_v24 = vadd.f32 %v1377_v20, %v3222_v44  ;;  %v1387_v6 = vadd.f32 %v1379_v59, %v3220_v43  ;;  %v2759_v43 = vld [vmem:[%s4034_s5] sm:$0xff]  }
0x115a   :  { %v3790_v8 = vadd.f32 %v1378_v4, %v3210_v35  ;;  %v3794_v39 = vadd.f32 %v1380_v17, %v3208_v34  ;;  %v1312_v34 = vsel %vm363_vm2, %v1306_v5, %v1260_v33  ;;  %2640 = vmatpush3.bf16.msra.mxu1 %v2759_v43  ;;  %v1607_v3 = vsub.s32 7, %v3199_v21 }
0x115b   :  { %v1418_v11 = vrot.slane %v1312_v34, 7  ;;  %v2575_v60 = vmul.f32 -1.442695, %v1385_v24  ;;  %v2577_v13 = vmul.f32 -1.442695, %v1387_v6  ;;  %2641 = vmatprep.subr.bf16.mxu1 %v3020_v32 }
0x115c   :  { %2939 = vtanh.f32 %v3790_v8  ;;  %v2576_v57 = vmul.f32 -1.442695, %v3790_v8  ;;  %v2578_v26 = vmul.f32 -1.442695, %v3794_v39 }
0x115d   :  { %2941 = vtanh.f32 %v3794_v39  ;;  %v1462_v39 = vrot.slane %v3772_v50, 7 }
0x115e   :  { %2943 = vpow2.f32 %v2575_v60  ;;  %2642 = vmatpush3.bf16.msra.mxu1 %v2760_v51  ;;  %v2765_v51 = vld [vmem:[%s4036_s7 + $0x10] sm:$0xff]  }
0x115f   :  { %2945 = vpow2.f32 %v2577_v13  ;;  %2643 = vmatprep.subr.bf16.mxu1 %v3020_v32 }
0x1162   :  { %2644 = vmatpush3.bf16.msra.mxu1 %v2761_v47  ;;  %v2766_v47 = vld [vmem:[%s4036_s7 + $0x18] sm:$0xff]  }
0x1163   :  { %2645 = vmatprep.subr.bf16.mxu1 %v3020_v32 }
0x1166   :  { %v2940_v9 = vpop.eup %2939  ;;  %2646 = vmatpush3.bf16.msra.mxu1 %v2762_v58 }
0x1167   :  { %1429 = vrot.lane.b32.xlu0 %v2940_v9, %s3019_s4  ;;  %v2942_v35 = vpop.eup %2941  ;;  %2657 = vmatprep.subr.bf16.mxu1 %v3020_v32  ;;  %v1461_v9 = vrot.slane %v3754_v7, 7 }
0x1168   :  { %1431 = vrot.lane.b32.xlu1 %v2942_v35, %s3019_s4  ;;  %v2944_v41 = vpop.eup %2943 }
0x1169   :  { %v1401_v37 = vadd.f32 1.0, %v2944_v41  ;;  %v2946_v33 = vpop.eup %2945 }
0x116a   :  { %v1403_v62 = vadd.f32 1.0, %v2946_v33  ;;  %v2579_v33 = vld [vmem:[%s4035_s6] ss:$0 sm:$0xff] }
0x116b   :  { %1419 = vrot.lane.b32.xlu0 %v1417_v63, %s3019_s4  ;;  %2947 = vrcp.f32 %v1401_v37 }
0x116c   :  { %1421 = vrot.lane.b32.xlu1 %v1418_v11, %s3019_s4  ;;  %2949 = vrcp.f32 %v1403_v62 }
0x1175   :  { %v2948_v0 = vpop.eup %2947 }
0x1176   :  { %v2950_v18 = vpop.eup %2949 }
0x11d9   :  { %v1430_v23 = vpop.permute.xlu0 %1429 }
0x11da   :  { %v1435_v61 = vmul.f32 %v2948_v0, %v1430_v23  ;;  %v1432_v44 = vpop.permute.xlu1 %1431 }
0x11db   :  { %v1436_v15 = vmul.f32 %v2950_v18, %v1432_v44 }
0x11dc   :  { %1439 = vrot.lane.b32.xlu0 %v1435_v61, %s3019_s4 }
0x11dd   :  { %1441 = vrot.lane.b32.xlu1 %v1436_v15, %s3019_s4  ;;  %v1420_v56 = vpop.permute.xlu0 %1419 }
0x11de   :  { %v1425_v38 = vmul.f32 %v2948_v0, %v1420_v56  ;;  %v1422_v36 = vpop.permute.xlu1 %1421 }
0x11df   :  { %v1426_v55 = vmul.f32 %v2950_v18, %v1422_v36 }
0x124e   :  { %v1440_v25 = vpop.permute.xlu0 %1439 }
0x124f   :  { %v1445_v19 = vadd.f32 %v1440_v25, %v1425_v38  ;;  %v1442_v12 = vpop.permute.xlu1 %1441 }
0x1250   :  { %v1446_v27 = vadd.f32 %v1442_v12, %v1426_v55  ;;  %v2763_v55 = vld [vmem:[%s4036_s7] sm:$0xff]  }
0x1251   :  { %2951 = vtanh.f32 %v1445_v19 }
0x1252   :  { %2953 = vtanh.f32 %v1446_v27  ;;  %v2764_v27 = vld [vmem:[%s4036_s7 + $0x8] sm:$0xff]  }
0x1253   :  { %2955 = vpow2.f32 %v2576_v57 }
0x1254   :  { %2957 = vpow2.f32 %v2578_v26  ;;  %v3913_v26 = vld [vmem:[%s4030_s1 + $0x4] sm:$0x3] }
0x125b   :  { %v2952_v45 = vpop.eup %2951 }
0x125c   :  { %1451 = vrot.lane.b32.xlu0 %v2952_v45, %s3019_s4  ;;  %v2954_v52 = vpop.eup %2953  ;;  %v3024_v45 = vmov 1966171168  }
0x125d   :  { %1453 = vrot.lane.b32.xlu1 %v2954_v52, %s3019_s4  ;;  %v2956_v10 = vpop.eup %2955  ;;  %v1916_v58 = vunpack.c.l.s4 %v3024_v45 }
0x125e   :  { %v1402_v1 = vadd.f32 1.0, %v2956_v10  ;;  %v2958_v4 = vpop.eup %2957 }
0x125f   :  { %v1404_v14 = vadd.f32 1.0, %v2958_v4  ;;  %v1917_v52 = vunpack.c.0.s8 %v1916_v58 }
0x1260   :  { %2959 = vrcp.f32 %v1402_v1 }
0x1261   :  { %2961 = vrcp.f32 %v1404_v14  ;;  %v1920_v57 = vsub.s32 %v1917_v52, %v3199_v21 }
0x1263   :  { %v1921_v10 = vrot.slane %v3913_v26, %v1920_v57 }
0x1265   :  { %v1922_v1 = vcombine.high %v1921_v10, %v1921_v10  ;;  %v1929_v4 = vrot.slane %v1921_v10, %v1920_v57 }
0x1267   :  { %v1936_v14 = vrot.slane %v1922_v1, %v1920_v57  ;;  %vm1939_vm15 = vcmp.eq.f32.partialorder %v1929_v4, 0.0 }
0x126a   :  { %v2960_v17 = vpop.eup %2959 }
0x126b   :  { %v2962_v63 = vpop.eup %2961 }
0x12ce   :  { %v1452_v54 = vpop.permute.xlu0 %1451 }
0x12cf   :  { %v1457_v53 = vmul.f32 %v2960_v17, %v1452_v54  ;;  %v1454_v35 = vpop.permute.xlu1 %1453  ;;  %v1941_v17 = vsel %vm1939_vm15, 1, %v3018_v2 }
0x12d0   :  { %v1458_v20 = vmul.f32 %v2962_v63, %v1454_v35  ;;  %v1946_v54 = vrot.slane %v1941_v17, %v3217_v40 }
0x12d1   :  { %v1465_v8 = vsel %vm362_vm3, %v1457_v53, %v1461_v9 }
0x12d2   :  { %v1608_v5 = vrot.slane %v1465_v8, %v1607_v3  ;;  %v1466_v42 = vsel %vm363_vm2, %v1458_v20, %v1462_v39  ;;  %vm3920_vm1 = vcmp.eq.s32.totalorder %v1946_v54, 1  ;;  %vm1957_vm2 = vcmask 64512  }
0x12d3   :  { %v1612_v60 = vrot.slane %v1466_v42, %v1607_v3  ;;  %v2018_v54 = vrot.slane %v3913_v26, %v3217_v40 }
0x12d4   :  { %v1613_v34 = vsel %vm1484_vm6, %v1608_v5, 0.0  ;;  %v1617_v11 = vsel %vm1469_vm5, %v1608_v5, 0.0 }
0x12d5   :  { %v1615_v24 = vadd.f32 %v1613_v34, %v3765_v48  ;;  %v1619_v7 = vadd.f32 %v1617_v11, %v3768_v49  ;;  %v1614_v50 = vsel %vm1484_vm6, %v1612_v60, 0.0  ;;  %v1618_v6 = vsel %vm1469_vm5, %v1612_v60, 0.0 }
0x12d6   :  { %v1616_v13 = vadd.f32 %v1614_v50, %v3782_v16  ;;  %v1620_v41 = vadd.f32 %v1618_v6, %v3785_v46  ;;  %vm2130_vm5 = vcmask 1043456   ;;  %vm2010_vm6 = vcmp.eq.s32.totalorder %v3199_v21, %v3243_v28 }
0x12d7   :  { %v1622_v59 = vsel %vm1621_vm14, %v1615_v24, %v1619_v7 }
0x12d8   :  { %v1624_v48 = vmul.f32 %v1622_v59, %v3248_v30  ;;  %v1623_v49 = vsel %vm1621_vm14, %v1616_v13, %v1620_v41 }
0x12d9   :  { %v1625_v31 = vmul.f32 %v1623_v49, %v3245_v29 }
0x12db   :  { %v1626_v37 = vpack.c.bf16 %v1625_v31, %v1624_v48 }
0x12dd   :  { %2648 = vmatmul.mubr.msk.bf16.vlgmr.msra.gmra.mrb[16].mxu1 %vm116_vm0, %v1626_v37 }
0x12de   :  { %2659 = vmatprep.mubr.msk.bf16.mxu1 %vm3021_vm13, %v3020_v32 }
0x13b0   :  { %v1703_v62 = vpop.f32.mrb[16].mxu1 }
0x13b1   :  { %v1704_v16 = vadd.f32 %v2579_v33, %v1703_v62  ;;  %v2649_v0 = vpop.f32.mrb[17].mxu1 }
0x13b2   :  { %v1706_v46 = vpop.f32.mrb[18].mxu1 }
0x13b3   :  { %v1710_v23 = vpack.c.bf16 %v1704_v16, %v1704_v16  ;;  %v1707_v30 = vadd.f32 %v2579_v33, %v1706_v46  ;;  %v2650_v61 = vpop.f32.mrb[19].mxu1 }
0x13b5   :  { %v1711_v18 = vpack.c.bf16 %v1707_v30, %v1707_v30  ;;  %1713 = vrot.lane.b32.xlu0 %v1710_v23, %s3019_s4 }
0x13b7   :  { %1762 = vrot.lane.b32.xlu1 %v1711_v18, %s3019_s4 }
0x13b9   :  { %1812 = vrot.lane.b32.xlu0 %v1710_v23, %s3022_s17 }
0x13bb   :  { %1810 = vrot.lane.b32.xlu1 %v1710_v23, %s3023_s18 }
0x13bd   :  { %1862 = vrot.lane.b32.xlu0 %v1711_v18, %s3022_s17  ;;  %s2512_s17 = sshll.u32 %s3025_s16, 4  ;;  %s2513_s17 = int_to_ptr.vmem [resolvable:$true] %s2512_s17 }
0x13be   :  { %p2999_p1 = scmp.lt.s32.totalorder %s2513_s17, %s2513_s17 }
0x13bf   :  { %1860 = vrot.lane.b32.xlu1 %v1711_v18, %s3023_s18  ;;  %s2994_s18 = scalar_lea.vmem %s2513_s17, 32 }
0x13c0   :  { %p2995_p0 = scmp.ne.s32.totalorder %s2513_s17, %s2994_s18  ;;  %p3000_p2 = scmp.lt.s32.totalorder %s2994_s18, %s2994_s18 }
0x13c2   :  { %p3001_p3 = por %p3000_p2, %p2999_p1 }
0x13c4   :  { %p3002_p4 = pnand %p3001_p3, %p2995_p0 }
0x1427   :  { %v1714_v29 = vpop.permute.xlu0 %1713 }
0x1428   :  { %v1719_v44 = vsel %vm1621_vm14, %v1714_v29, 0 }
0x1429   :  { %2652 = vmatpush3.bf16.xpose.msra.mxu0 %v1719_v44  ;;  %v1763_v15 = vpop.permute.xlu1 %1762 }
0x142a   :  { %v1768_v43 = vsel %vm1621_vm14, %v1763_v15, 0  ;;  %2663 = vmatprep.subr.bf16.mxu0 %v3020_v32 }
0x142b   :  { %v1813_v56 = vpop.permute.xlu0 %1812  ;;  %2658 = vmatpush3.bf16.xpose.msra.mxu1 %v1768_v43 }
0x142c   :  { %2669 = vmatprep.subr.bf16.mxu1 %v3020_v32  ;;  %v1818_v25 = vsel %vm1621_vm14, %v1813_v56, 0 }
0x142d   :  { %v1811_v19 = vpop.permute.xlu1 %1810 }
0x142f   :  { %v1863_v38 = vpop.permute.xlu0 %1862 }
0x1430   :  { %2654 = vmatmul.mubr.msk.bf16.vlgmr.msra.gmra.mrb[20].mxu0 %vm1621_vm14, %v1710_v23  ;;  %v1868_v36 = vsel %vm1621_vm14, %v1863_v38, 0 }
0x1431   :  { %2664 = vmatpush3.bf16.xpose.msra.mxu0 %v1818_v25  ;;  %2665 = vmatprep.mubr.msk.bf16.mxu0 %vm3021_vm13, %v3020_v32  ;;  %v1861_v12 = vpop.permute.xlu1 %1860 }
0x1432   :  { %2660 = vmatmul.mubr.msk.bf16.vlgmr.msra.gmra.mrb[20].mxu1 %vm1621_vm14, %v1711_v18  ;;  %2675 = vmatprep.subr.bf16.mxu0 %v3020_v32 }
0x1433   :  { %2670 = vmatpush3.bf16.xpose.msra.mxu1 %v1868_v36  ;;  %2671 = vmatprep.mubr.msk.bf16.mxu1 %vm3021_vm13, %v3020_v32 }
0x1434   :  { %2687 = vmatprep.subr.bf16.mxu1 %v3020_v32 }
0x1438   :  { %2666 = vmatmul.mubr.msk.bf16.vlgmr.msra.gmra.mrb[24].mxu0 %vm1621_vm14, %v1811_v19 }
0x1439   :  { %2676 = vmatpush3.bf16.msra.mxu0 %v2763_v55  ;;  %2683 = vmatprep.mubr.msk.bf16.mxu0 %vm3021_vm13, %v3020_v32 }
0x143a   :  { %2672 = vmatmul.mubr.msk.bf16.vlgmr.msra.gmra.mrb[24].mxu1 %vm1621_vm14, %v1861_v12  ;;  %2677 = vmatprep.subr.bf16.mxu0 %v3020_v32 }
0x143b   :  { %2689 = vmatprep.mubr.msk.bf16.mxu1 %vm3021_vm13, %v3020_v32 }
0x143d   :  { %2678 = vmatpush3.bf16.msra.mxu0 %v2764_v27 }
0x143e   :  { %2679 = vmatprep.subr.bf16.mxu0 %v3020_v32 }
0x1441   :  { %2680 = vmatpush3.bf16.msra.mxu0 %v2765_v51 }
0x1442   :  { %2681 = vmatprep.subr.bf16.mxu0 %v3020_v32 }
0x1445   :  { %2682 = vmatpush3.bf16.msra.mxu0 %v2766_v47 }
0x1446   :  { %2699 = vmatprep.subr.bf16.mxu0 %v3020_v32 }
0x1448   :  { %2684 = vmatmul.mubr.msk.bf16.vlgmr.msra.gmra.mrb[28].mxu0 %vm116_vm0, %v1626_v37  ;;  %vm1940_vm0 = vcmp.eq.f32.partialorder %v1936_v14, 0.0 }
0x1449   :  { %2703 = vmatprep.mubr.msk.bf16.mxu0 %vm3021_vm13, %v3020_v32  ;;  %v1942_v3 = vsel %vm1940_vm0, 1, %v3018_v2 }
0x144a   :  { %v1950_v9 = vrot.slane %v1942_v3, %v3217_v40 }
0x144c   :  { %vm3924_vm3 = vcmp.eq.s32.totalorder %v1950_v9, 1  ;;  %v2025_v9 = vrot.slane %v3913_v26, %v3202_v22 }
0x1503   :  { %v1755_v53 = vpop.f32.mrb[20].mxu0 }
0x1504   :  { %v1910_v5 = vmul.f32 0.17677669, %v1755_v53  ;;  %v2655_v63 = vpop.f32.mrb[21].mxu0 }
0x1505   :  { %v1758_v39 = vpop.f32.mrb[22].mxu0  ;;  %v1804_v35 = vpop.f32.mrb[20].mxu1 }
0x1506   :  { %v1911_v11 = vmul.f32 0.17677669, %v1804_v35  ;;  %v2656_v2 = vpop.f32.mrb[23].mxu0  ;;  %v2661_v20 = vpop.f32.mrb[21].mxu1  ;;  %v1953_v24 = vsel %vm3920_vm1, -1e+09, %v1910_v5 }
0x1507   :  { %v1807_v7 = vpop.f32.mrb[22].mxu1  ;;  %v1958_v42 = vsel %vm1957_vm2, %v1953_v24, -inf }
0x1508   :  { %1959 = vmax.xlane.f32.xlu0 %v1958_v42  ;;  %v2662_v59 = vpop.f32.mrb[23].mxu1  ;;  %v1954_v60 = vsel %vm3924_vm3, -1e+09, %v1911_v11 }
0x1509   :  { %v1961_v6 = vsel %vm1957_vm2, %v1954_v60, -inf }
0x150b   :  { %v1854_v50 = vpop.f32.mrb[24].mxu0 }
0x150c   :  { %v1912_v13 = vmul.f32 0.17677669, %v1854_v50  ;;  %v2667_v41 = vpop.f32.mrb[25].mxu0  ;;  %1962 = vmax.xlane.f32.xlu0 %v1961_v6 }
0x150d   :  { %v1857_v48 = vpop.f32.mrb[26].mxu0  ;;  %v1904_v49 = vpop.f32.mrb[24].mxu1 }
0x150e   :  { %v1913_v31 = vmul.f32 0.17677669, %v1904_v49  ;;  %v2668_v37 = vpop.f32.mrb[27].mxu0  ;;  %v2673_v33 = vpop.f32.mrb[25].mxu1  ;;  %v1955_v62 = vsel %vm3920_vm1, -1e+09, %v1912_v13 }
0x150f   :  { %v1907_v16 = vpop.f32.mrb[26].mxu1  ;;  %v1964_v0 = vsel %vm1957_vm2, %v1955_v62, -inf }
0x1510   :  { %1965 = vmax.xlane.f32.xlu1 %v1964_v0  ;;  %v2674_v46 = vpop.f32.mrb[27].mxu1  ;;  %v1956_v23 = vsel %vm3924_vm3, -1e+09, %v1913_v31 }
0x1511   :  { %v1967_v30 = vsel %vm1957_vm2, %v1956_v23, -inf }
0x1512   :  { %1968 = vmax.xlane.f32.xlu0 %v1967_v30  ;;  %v2767_v30 = vld [vmem:[%s4038_s9] sm:$0xff]  }
0x1513   :  { %2700 = vmatpush3.bf16.msra.mxu0 %v2767_v30 }
0x1514   :  { %2701 = vmatprep.subr.bf16.mxu0 %v3020_v32 }
0x151b   :  { %v2111_v61 = vpop.f32.mrb[28].mxu0 }
0x151c   :  { %v2118_v18 = vpack.c.bf16 %v2111_v61, %v2111_v61  ;;  %v2685_v29 = vpop.f32.mrb[29].mxu0  ;;  %v2768_v61 = vld [vmem:[%s4038_s9 + $0x8] sm:$0xff]  }
0x151d   :  { %v3940_v44 = vpop.f32.mrb[30].mxu0  ;;  %2702 = vmatpush3.bf16.msra.mxu0 %v2768_v61 }
0x151e   :  { %v2132_v15 = vsel %vm2130_vm5, %v2118_v18, 0  ;;  %v2686_v43 = vpop.f32.mrb[31].mxu0  ;;  %v2119_v49 = vpack.c.bf16 %v3940_v44, %v3940_v44  ;;  %2713 = vmatprep.subr.bf16.mxu0 %v3020_v32 }
0x151f   :  { %2688 = vmatpush3.bf16.msra.mxu1 %v2132_v15 }
0x1520   :  { %2693 = vmatprep.subr.bf16.mxu1 %v3020_v32  ;;  %v2178_v28 = vsel %vm2130_vm5, %v2119_v49, 0 }
0x1595   :  { %v1960_v56 = vpop.xlane.xlu0 %1959 }
0x1596   :  { %v1970_v38 = vsub.f32 %v1953_v24, %v1960_v56 }
0x1598   :  { %v1974_v25 = vmul.f32 1.442695, %v1970_v38  ;;  %v2594_v38 = vld [vmem:[%s4037_s8] ss:$0 sm:$0xff] }
0x1599   :  { %v1963_v36 = vpop.xlane.xlu0 %1962 }
0x159a   :  { %2963 = vpow2.f32 %v1974_v25  ;;  %v1971_v19 = vsub.f32 %v1954_v60, %v1963_v36 }
0x159c   :  { %v1976_v55 = vmul.f32 1.442695, %v1971_v19 }
0x159d   :  { %v1966_v12 = vpop.xlane.xlu1 %1965 }
0x159e   :  { %2965 = vpow2.f32 %v1976_v55  ;;  %v1972_v27 = vsub.f32 %v1955_v62, %v1966_v12 }
0x159f   :  { %v1969_v51 = vpop.xlane.xlu0 %1968 }
0x15a0   :  { %v1978_v47 = vmul.f32 1.442695, %v1972_v27  ;;  %v1973_v45 = vsub.f32 %v1956_v23, %v1969_v51 }
0x15a2   :  { %2967 = vpow2.f32 %v1978_v47  ;;  %v1980_v58 = vmul.f32 1.442695, %v1973_v45 }
0x15a4   :  { %v2964_v52 = vpop.eup %2963  ;;  %2969 = vpow2.f32 %v1980_v58 }
0x15a5   :  { %v1982_v57 = vsel %vm1957_vm2, %v2964_v52, 0.0 }
0x15a6   :  { %1983 = vadd.xlane.f32.xlu1 %v1982_v57 }
0x15a8   :  { %v2966_v10 = vpop.eup %2965 }
0x15a9   :  { %v1985_v1 = vsel %vm1957_vm2, %v2966_v10, 0.0 }
0x15aa   :  { %1986 = vadd.xlane.f32.xlu1 %v1985_v1 }
0x15ac   :  { %v2968_v4 = vpop.eup %2967 }
0x15ad   :  { %v1988_v14 = vsel %vm1957_vm2, %v2968_v4, 0.0 }
0x15ae   :  { %v2970_v17 = vpop.eup %2969  ;;  %1989 = vadd.xlane.f32.xlu0 %v1988_v14  ;;  %v2522_v14 = vld [vmem:[%s4030_s1 + $0x6] sm:$0x3] }
0x15af   :  { %v1991_v3 = vsel %vm1957_vm2, %v2970_v17, 0.0 }
0x15b2   :  { %1992 = vadd.xlane.f32.xlu0 %v1991_v3  ;;  %v2394_v3 = vrot.slane %v2522_v14, %v3202_v22  ;;  %v2769_v22 = vld [vmem:[%s4040_s11] sm:$0xff]  }
0x15bb   :  { %2020 = vbcast.lane.b32.xlu1 %v2018_v54, 256 }
0x15c8   :  { %2027 = vbcast.lane.b32.xlu0 %v2025_v9, 256 }
0x1633   :  { %v1984_v53 = vpop.xlane.xlu1 %1983 }
0x1634   :  { %2971 = vrcp.f32 %v1984_v53 }
0x1637   :  { %v1987_v8 = vpop.xlane.xlu1 %1986 }
0x1638   :  { %2973 = vrcp.f32 %v1987_v8 }
0x163b   :  { %v1990_v5 = vpop.xlane.xlu0 %1989  ;;  %v2021_v60 = vpop.permute.xlu1 %2020 }
0x163c   :  { %2975 = vrcp.f32 %v1990_v5 }
0x163e   :  { %v2972_v39 = vpop.eup %2971 }
0x163f   :  { %v1993_v63 = vpop.xlane.xlu0 %1992  ;;  %v1998_v34 = vmul.f32 %v2972_v39, %v2964_v52 }
0x1640   :  { %2977 = vrcp.f32 %v1993_v63 }
0x1641   :  { %v2002_v20 = vsel %vm1957_vm2, %v1998_v34, 0.0 }
0x1642   :  { %v2974_v35 = vpop.eup %2973 }
0x1643   :  { %v1999_v7 = vmul.f32 %v2974_v35, %v2966_v10  ;;  %v2028_v33 = vpop.permute.xlu0 %2027 }
0x1645   :  { %v2005_v6 = vsel %vm1957_vm2, %v1999_v7, 0.0 }
0x1646   :  { %v2976_v11 = vpop.eup %2975 }
0x1647   :  { %v2000_v2 = vmul.f32 %v2976_v11, %v2968_v4 }
0x1649   :  { %v2003_v24 = vsel %vm1957_vm2, %v2000_v2, 0.0 }
0x164a   :  { %v2978_v26 = vpop.eup %2977  ;;  %v2004_v42 = vadd.f32 %v2003_v24, %v2002_v20 }
0x164b   :  { %v2001_v59 = vmul.f32 %v2978_v26, %v2970_v17  ;;  %v2387_v17 = vrot.slane %v2522_v14, %v3217_v40  ;;  %v2770_v40 = vld [vmem:[%s4040_s11 + $0x8] sm:$0xff]  }
0x164c   :  { %v2008_v50 = vmul.f32 0.5, %v2004_v42 }
0x164d   :  { %v2006_v13 = vsel %vm1957_vm2, %v2001_v59, 0.0  ;;  %v2600_v59 = vld [vmem:[%s4039_s10] ss:$0 sm:$0xff] }
0x164e   :  { %v2013_v41 = vsel %vm2010_vm6, 1.0, %v2008_v50  ;;  %v2007_v48 = vadd.f32 %v2006_v13, %v2005_v6 }
0x164f   :  { %v2029_v31 = vmul.f32 %v2021_v60, %v2013_v41 }
0x1650   :  { %v2009_v37 = vmul.f32 0.5, %v2007_v48 }
0x1651   :  { %v3960_v62 = vpack.c.bf16 %v2029_v31, %v2029_v31  ;;  %v2031_v16 = vsel %vm1957_vm2, %v2029_v31, 0.0 }
0x1652   :  { %2032 = vadd.xlane.f32.xlu1 %v2031_v16  ;;  %v2014_v21 = vsel %vm2010_vm6, 1.0, %v2009_v37 }
0x1653   :  { %v2030_v0 = vmul.f32 %v2028_v33, %v2014_v21  ;;  %2690 = vmatmul.mubr.msk.bf16.vlgmr.msra.gmra.mrb[28].mxu1 %vm1957_vm2, %v3960_v62 }
0x1654   :  { %2694 = vmatpush3.bf16.msra.mxu1 %v2178_v28  ;;  %2695 = vmatprep.mubr.msk.bf16.mxu1 %vm3021_vm13, %v3020_v32 }
0x1655   :  { %v2034_v46 = vsel %vm1957_vm2, %v2030_v0, 0.0  ;;  %2707 = vmatprep.subr.bf16.mxu1 %v3020_v32  ;;  %v2044_v23 = vpack.c.bf16 %v2030_v0, %v2030_v0 }
0x1656   :  { %2035 = vadd.xlane.f32.xlu0 %v2034_v46 }
0x165b   :  { %2696 = vmatmul.mubr.msk.bf16.vlgmr.msra.gmra.mrb[32].mxu1 %vm1957_vm2, %v2044_v23 }
0x165c   :  { %2709 = vmatprep.mubr.msk.bf16.mxu1 %vm3021_vm13, %v3020_v32 }
0x1663   :  { %2389 = vbcast.lane.b32.xlu1 %v2387_v17, 256 }
0x166c   :  { %2396 = vbcast.lane.b32.xlu0 %v2394_v3, 256 }
0x16df   :  { %v2033_v18 = vpop.xlane.xlu1 %2032 }
0x16e0   :  { %v2037_v44 = vadd.f32 1.0, %v2033_v18 }
0x16e2   :  { %2979 = vrcp.f32 %v2037_v44 }
0x16e3   :  { %v2036_v29 = vpop.xlane.xlu0 %2035  ;;  %v2390_v34 = vpop.permute.xlu1 %2389 }
0x16e4   :  { %v2038_v15 = vadd.f32 1.0, %v2036_v29  ;;  %v2398_v2 = vrot.slane %v2390_v34, 4 }
0x16e6   :  { %2981 = vrcp.f32 %v2038_v15  ;;  %v2399_v24 = vadd.f32 %v2398_v2, %v2390_v34 }
0x16e7   :  { %v2397_v11 = vpop.permute.xlu0 %2396 }
0x16e8   :  { %v2404_v20 = vrot.slane %v2397_v11, 4  ;;  %v2400_v26 = vrot.slane %v2399_v24, 2 }
0x16ea   :  { %v2405_v7 = vadd.f32 %v2404_v20, %v2397_v11  ;;  %v2401_v60 = vadd.f32 %v2400_v26, %v2399_v24 }
0x16ec   :  { %v2980_v55 = vpop.eup %2979  ;;  %v2406_v42 = vrot.slane %v2405_v7, 2  ;;  %v2402_v49 = vrot.slane %v2401_v60, 1 }
0x16f0   :  { %v2982_v45 = vpop.eup %2981 }
0x1726   :  { %v2168_v43 = vpop.f32.mrb[28].mxu1 }
0x1727   :  { %v2691_v56 = vpop.f32.mrb[29].mxu1  ;;  %v2169_v19 = vadd.f32 %v2594_v38, %v2168_v43 }
0x1728   :  { %v2171_v25 = vpop.f32.mrb[30].mxu1 }
0x1729   :  { %v2692_v36 = vpop.f32.mrb[31].mxu1  ;;  %v2220_v27 = vmul.f32 %v2980_v55, %v2169_v19 }
0x172b   :  { %v2222_v10 = vmax.f32 %v2220_v27, 0.0 }
0x172e   :  { %v2214_v12 = vpop.f32.mrb[32].mxu1 }
0x172f   :  { %v2215_v51 = vadd.f32 %v2594_v38, %v2214_v12  ;;  %v2697_v47 = vpop.f32.mrb[33].mxu1 }
0x1730   :  { %v2217_v58 = vpop.f32.mrb[34].mxu1 }
0x1731   :  { %v2221_v52 = vmul.f32 %v2982_v45, %v2215_v51  ;;  %v2698_v57 = vpop.f32.mrb[35].mxu1 }
0x1733   :  { %v2223_v1 = vmax.f32 %v2221_v52, 0.0 }
0x1735   :  { %v2224_v4 = vpack.c.bf16 %v2223_v1, %v2222_v10 }
0x1737   :  { %2704 = vmatmul.mubr.msk.bf16.vlgmr.msra.gmra.mrb[32].mxu0 %vm1621_vm14, %v2224_v4 }
0x1738   :  { %2715 = vmatprep.mubr.msk.bf16.mxu0 %vm3021_vm13, %v3020_v32 }
0x180a   :  { %v2278_v54 = vpop.f32.mrb[32].mxu0 }
0x180b   :  { %v2285_v9 = vpack.c.bf16 %v2278_v54, %v2278_v54  ;;  %v2705_v53 = vpop.f32.mrb[33].mxu0 }
0x180c   :  { %v2281_v8 = vpop.f32.mrb[34].mxu0 }
0x180d   :  { %v2295_v5 = vsel %vm2130_vm5, %v2285_v9, 0  ;;  %v2286_v63 = vpack.c.bf16 %v2281_v8, %v2281_v8  ;;  %v2706_v39 = vpop.f32.mrb[35].mxu0  ;;  %v2603_v9 = vld [vmem:[%s4041_s12] ss:$0 sm:$0xff] }
0x180e   :  { %2708 = vmatpush3.bf16.msra.mxu1 %v2295_v5 }
0x180f   :  { %v2338_v35 = vsel %vm2130_vm5, %v2286_v63, 0  ;;  %2719 = vmatprep.subr.bf16.mxu1 %v3020_v32 }
0x1810   :  { %2714 = vmatpush3.bf16.msra.mxu0 %v2338_v35 }
0x1811   :  { %2710 = vmatmul.mubr.msk.bf16.vlgmr.msra.gmra.mrb[36].mxu1 %vm1957_vm2, %v3960_v62 }
0x1812   :  { %2723 = vmatprep.mubr.msk.bf16.mxu1 %vm3021_vm13, %v3020_v32  ;;  %2720 = vmatpush3.bf16.msra.mxu1 %v2769_v22 }
0x1813   :  { %2716 = vmatmul.mubr.msk.bf16.vlgmr.msra.gmra.mrb[36].mxu0 %vm1957_vm2, %v2044_v23  ;;  %2721 = vmatprep.subr.bf16.mxu1 %v3020_v32  ;;  %v2407_v32 = vadd.f32 %v2406_v42, %v2405_v7  ;;  %v2403_v23 = vadd.f32 %v2402_v49, %v2401_v60 }
0x1815   :  { %v2408_v21 = vrot.slane %v2407_v32, 1  ;;  %2983 = vrcp.f32 %v2403_v23 }
0x1816   :  { %2722 = vmatpush3.bf16.msra.mxu1 %v2770_v40 }
0x1817   :  { %v2409_v18 = vadd.f32 %v2408_v21, %v2407_v32 }
0x1819   :  { %2985 = vrcp.f32 %v2409_v18 }
0x18e4   :  { %v2331_v50 = vpop.f32.mrb[36].mxu1 }
0x18e5   :  { %v2332_v6 = vadd.f32 %v2600_v59, %v2331_v50  ;;  %v2711_v13 = vpop.f32.mrb[37].mxu1 }
0x18e6   :  { %v2334_v41 = vpop.f32.mrb[38].mxu1  ;;  %v2374_v48 = vpop.f32.mrb[36].mxu0 }
0x18e7   :  { %v2380_v31 = vmul.f32 %v2980_v55, %v2332_v6  ;;  %v2375_v37 = vadd.f32 %v2600_v59, %v2374_v48  ;;  %v2712_v33 = vpop.f32.mrb[39].mxu1  ;;  %v2717_v62 = vpop.f32.mrb[37].mxu0 }
0x18e8   :  { %v2377_v16 = vpop.f32.mrb[38].mxu0 }
0x18e9   :  { %v2382_v28 = vmax.f32 %v2380_v31, 0.0  ;;  %v2381_v0 = vmul.f32 %v2982_v45, %v2375_v37  ;;  %v2718_v46 = vpop.f32.mrb[39].mxu0  ;;  %v2984_v45 = vpop.eup %2983 }
0x18ea   :  { %v2986_v57 = vpop.eup %2985 }
0x18eb   :  { %v2410_v30 = vmul.f32 %v2390_v34, %v2382_v28  ;;  %v2383_v61 = vmax.f32 %v2381_v0, 0.0 }
0x18ed   :  { %v2412_v29 = vsel %vm1621_vm14, %v2410_v30, 0.0  ;;  %v2411_v44 = vmul.f32 %v2397_v11, %v2383_v61 }
0x18ee   :  { %v2413_v15 = vrot.slane %v2412_v29, 4 }
0x18ef   :  { %v2419_v43 = vsel %vm1621_vm14, %v2411_v44, 0.0 }
0x18f0   :  { %v2414_v56 = vadd.f32 %v2413_v15, %v2412_v29  ;;  %v2420_v38 = vrot.slane %v2419_v43, 4 }
0x18f2   :  { %v2415_v25 = vrot.slane %v2414_v56, 2  ;;  %v2421_v36 = vadd.f32 %v2420_v38, %v2419_v43 }
0x18f4   :  { %v2416_v19 = vadd.f32 %v2415_v25, %v2414_v56  ;;  %v2422_v55 = vrot.slane %v2421_v36, 2 }
0x18f6   :  { %v2417_v12 = vrot.slane %v2416_v19, 1  ;;  %v2423_v27 = vadd.f32 %v2422_v55, %v2421_v36 }
0x18f8   :  { %v2418_v51 = vadd.f32 %v2417_v12, %v2416_v19  ;;  %v2424_v47 = vrot.slane %v2423_v27, 1 }
0x18fa   :  { %v2427_v58 = vmul.f32 %v2984_v45, %v2418_v51  ;;  %v2425_v52 = vadd.f32 %v2424_v47, %v2423_v27 }
0x18fc   :  { %v2430_v10 = vpack.c.bf16 %v2427_v58, %v2427_v58  ;;  %v2429_v1 = vmul.f32 %v2986_v57, %v2425_v52 }
0x18fe   :  { %v2431_v4 = vpack.c.bf16 %v2429_v1, %v2429_v1  ;;  %v2445_v14 = vunpack.c.l.b16 %v2430_v10 }
0x1900   :  { %v2446_v17 = vunpack.c.l.b16 %v2431_v4 }
0x1902   :  { %v2447_v3 = vsel %vm383_vm4, %v2446_v17, %v2445_v14 }
0x1903   :  { %v2448_v54 = vpack.c.b16 %v2447_v3, %v2447_v3 }
0x1905   :  { %2724 = vmatmul.mubr.msk.bf16.vlgmr.msra.gmra.mrb[40].mxu1 %vm1621_vm14, %v2448_v54 }
0x19d8   :  { %v2498_v53 = vpop.f32.mrb[40].mxu1 }
0x19d9   :  { %v2499_v8 = vadd.f32 %v2603_v9, %v2498_v53  ;;  %v2725_v5 = vpop.f32.mrb[41].mxu1 }
0x19da   :  { %v2501_v63 = vpop.f32.mrb[42].mxu1 }
0x19db   :  { %v2726_v39 = vpop.f32.mrb[43].mxu1  ;;  %2505 = vst.msk [vmem:[#allocation2] sm:$0x3] %vm2504_vm7, %v2499_v8 }
0x19dc   :  { %3005 = shalt.err (!%p3002_p4)
}
0x19dd   :  { %s3006_s12 = scalar_lea.hbm %s4042_s13, 32 }
0x19de   :  { %p3007_p5 = scmp.ne.s32.totalorder %s4042_s13, %s3006_s12  ;;  %p3010_p6 = scmp.lt.u32.totalorder %s3006_s12, %s4042_s13 }
0x19e0   :  { %p3012_p7 = pnand %p3010_p6, %p3007_p5 }
0x19e2   :  { %3015 = shalt.err (!%p3012_p7)
}
0x19e3   :  { %2515 = dma.vmem_to_hbm [thread:$0]  %s2513_s17, 32, %s4042_s13, [#allocation3]  }
0x19e4   :  { %3016 = dma.done.wait [#allocation3], 32  }
0x19e5   :  { %3017 = vsyncadd [#allocation3], 4294967264 }
0x19e6   :  { %2519 = vsyncpa [#allocation3], 1 }

</bundles_post_ra>
